<compile_context>
chip_gen: v7x
topology: tpu7x:2x2x1
jax: 0.10.0
libtpu: 0.0.40
codegen_flags: <defaults>
</compile_context>

<pallas_src>
import math
import functools

import jax
import jax.numpy as jnp
from jax.experimental import pallas as pl
from jax.experimental.pallas import tpu as pltpu

LN_EPS = 1e-12                      # BERT LayerNorm eps


def _tpu_setup():
    """Generation-aware VMEM limit and EUP (transcendental) compute dtype."""
    kind = ""
    try:
        kind = jax.devices()[0].device_kind.lower()
    except Exception:
        pass

    vmem_cap = None
    try:
        vmem_cap = int(pltpu.get_tpu_info().vmem_capacity_bytes)
    except Exception:
        vmem_cap = None
    if vmem_cap is None or vmem_cap <= 0:
        # Fallback heuristic: v7x has 64 MiB per TC, older generations 128 MiB.
        vmem_cap = 64 * 1024 * 1024 if "v7" in kind else 128 * 1024 * 1024

    # Leave ~25% headroom for Mosaic internal scratch / double-buffering:
    # ~48 MiB on v7x, ~96 MiB on v5e/v6e.
    vmem_limit = int(min(vmem_cap * 3 // 4, 112 * 1024 * 1024))

    # v6e/v7x have a bf16 EUP/VPU path; v5e and older do not -> keep f32 there.
    old_gen = (not kind) or any(t in kind for t in ("v2", "v3", "v4", "v5"))
    eup_dtype = jnp.float32 if old_gen else jnp.bfloat16
    return vmem_limit, eup_dtype


VMEM_LIMIT, _EUP_DTYPE = _tpu_setup()


def _pick_tile(dim, pref, quanta):
    """Largest multiple of a quantum <= `pref` that divides `dim`, else `dim`.

    `quanta` may be a tuple of quanta tried in order (e.g. (256, 128) so the
    lane tile prefers MXU-width-aligned 256 multiples but can fall back to
    128).  At the toy shapes in __main__ every dim is <= pref, so tiles cover
    the full axis (single block).  At real BERT sizes (M=B*S=4096, H=768/1024,
    3H/4H up to 4096) this yields 512/768/1024-granular tiles that pipeline.
    """
    if isinstance(quanta, int):
        quanta = (quanta,)
    if dim <= pref:
        return dim
    for q in quanta:
        t = (pref // q) * q
        while t >= q:
            if dim % t == 0:
                return t
            t -= q
    return dim


# ----------------------------- Pallas kernels ------------------------------

def _matmul_bias_kernel(x_ref, w_ref, b_ref, o_ref, acc_ref, *, activation,
                        eup_dtype):
    """Tiled x@w + b (optional GELU). Grid (Mb, Nb, Kb), K innermost."""
    k = pl.program_id(2)

    @pl.when(k == 0)
    def _():
        acc_ref[...] = jnp.zeros_like(acc_ref)

    acc_ref[...] += jnp.dot(x_ref[...], w_ref[...],
                            preferred_element_type=jnp.float32)

    @pl.when(k == pl.num_programs(2) - 1)
    def _():
        h = acc_ref[...] + b_ref[...]
        if activation == "gelu":
            # TODO(synk): HF BERT uses exact erf-based GELU; tanh approximation here.
            c = math.sqrt(2.0 / math.pi)
            hx = h.astype(eup_dtype)           # bf16 tanh on v6e/v7x, f32 on v5e
            t = jnp.tanh(c * (hx + 0.044715 * (hx * hx * hx)))
            h = 0.5 * h * (1.0 + t.astype(jnp.float32))
        o_ref[...] = h.astype(o_ref.dtype)


def _matmul_add_ln_kernel(x_ref, w_ref, b_ref, r_ref, g_ref, beta_ref,
                          o_ref, acc_ref, *, eps):
    """Tiled x@w + b + residual, then LayerNorm over the (full) lane axis."""
    k = pl.program_id(1)

    @pl.when(k == 0)
    def _():
        acc_ref[...] = jnp.zeros_like(acc_ref)

    acc_ref[...] += jnp.dot(x_ref[...], w_ref[...],
                            preferred_element_type=jnp.float32)

    @pl.when(k == pl.num_programs(1) - 1)
    def _():
        h = acc_ref[...] + b_ref[...] + r_ref[...].astype(jnp.float32)
        mu = jnp.mean(h, axis=-1, keepdims=True)
        hc = h - mu
        var = jnp.mean(hc * hc, axis=-1, keepdims=True)
        o_ref[...] = (hc * jax.lax.rsqrt(var + eps) * g_ref[...]
                      + beta_ref[...]).astype(o_ref.dtype)


def _add_ln_kernel(a_ref, b_ref, g_ref, beta_ref, o_ref, *, eps):
    """LayerNorm(a + b), row-tiled, math in f32."""
    x = a_ref[...].astype(jnp.float32) + b_ref[...].astype(jnp.float32)
    mu = jnp.mean(x, axis=-1, keepdims=True)
    xc = x - mu
    var = jnp.mean(xc * xc, axis=-1, keepdims=True)
    o_ref[...] = (xc * jax.lax.rsqrt(var + eps) * g_ref[...]
                  + beta_ref[...]).astype(o_ref.dtype)


def _attention_out_ln_kernel(qkv_q_ref, qkv_kv_ref, mask_ref, wo_ref, bo_ref,
                             resid_ref, g_ref, beta_ref, o_ref, *,
                             n_heads, head_dim, hidden, eps, exp_dtype):
    """Per (batch, q-row-tile) attention + fused output projection/residual/LN.

    qkv_q_ref : (TQ, H) or (TQ, 3H) query rows (Q occupies columns [0, H)).
    qkv_kv_ref: (S, 3H) full rows of the batch (K/V columns sliced per head).
    The per-head contexts are concatenated and the attention-output dense,
    residual add and LayerNorm run in-kernel, so the only HBM store is a
    single lane-dense (TQ, H) block.
    """
    scale = 1.0 / math.sqrt(head_dim)
    # Additive key mask built in-kernel from the (1, S) validity row.
    neg = (1.0 - mask_ref[0].astype(jnp.float32)) * -10000.0            # (1, S)

    ctxs = []
    for h in range(n_heads):
        q = qkv_q_ref[:, h * head_dim:(h + 1) * head_dim] * scale       # (TQ, Dh) bf16
        kk = qkv_kv_ref[:, hidden + h * head_dim: hidden + (h + 1) * head_dim]
        v = qkv_kv_ref[:, 2 * hidden + h * head_dim: 2 * hidden + (h + 1) * head_dim]
        s = jax.lax.dot_general(q, kk, (((1,), (1,)), ((), ())),
                                preferred_element_type=jnp.float32)     # (TQ, S)
        s = s + neg
        s = s - jnp.max(s, axis=-1, keepdims=True)
        p = jnp.exp(s.astype(exp_dtype))                                # EUP dtype
        inv = pl.reciprocal(
            jnp.sum(p.astype(jnp.float32), axis=-1, keepdims=True), approx=True)
        ctx = jnp.dot(p.astype(jnp.bfloat16), v,
                      preferred_element_type=jnp.float32)               # (TQ, Dh)
        ctxs.append(ctx * inv)                                          # normalize post-PV

    ctx_full = jnp.concatenate(ctxs, axis=-1)                           # (TQ, H) f32

    # Fused attention output projection + bias + residual + LayerNorm.
    hproj = jnp.dot(ctx_full.astype(jnp.bfloat16), wo_ref[...],
                    preferred_element_type=jnp.float32)                 # (TQ, H)
    hres = hproj + bo_ref[...] + resid_ref[...].astype(jnp.float32)
    mu = jnp.mean(hres, axis=-1, keepdims=True)
    hc = hres - mu
    var = jnp.mean(hc * hc, axis=-1, keepdims=True)
    o_ref[...] = (hc * jax.lax.rsqrt(var + eps) * g_ref[...]
                  + beta_ref[...]).astype(o_ref.dtype)


# ------------------------------ pallas_call wrappers ------------------------

def linear(x, w, b, *, activation=None, out_dtype=jnp.bfloat16):
    """x:(M,K) bf16 @ w:(K,N) bf16 + b:(N,) f32 -> (M,N), tiled + pipelined."""
    M, K = x.shape
    N = w.shape[1]
    TM = _pick_tile(M, 512, 16)
    TN = _pick_tile(N, 1024, (256, 128))   # MXU-width-aligned lane tiles
    TK = _pick_tile(K, 512, 128)
    grid = (M // TM, N // TN, K // TK)
    kern = functools.partial(_matmul_bias_kernel, activation=activation,
                             eup_dtype=_EUP_DTYPE)
    return pl.pallas_call(
        kern,
        out_shape=jax.ShapeDtypeStruct((M, N), out_dtype),
        grid_spec=pltpu.PrefetchScalarGridSpec(
            num_scalar_prefetch=0,
            grid=grid,
            in_specs=[
                pl.BlockSpec((TM, TK), lambda i, j, k: (i, k)),
                pl.BlockSpec((TK, TN), lambda i, j, k: (k, j)),
                pl.BlockSpec((1, TN), lambda i, j, k: (0, j)),
            ],
            out_specs=pl.BlockSpec((TM, TN), lambda i, j, k: (i, j)),
            scratch_shapes=[pltpu.VMEM((TM, TN), jnp.float32)],
        ),
        compiler_params=pltpu.CompilerParams(
            dimension_semantics=("parallel", "parallel", "arbitrary"),
            vmem_limit_bytes=VMEM_LIMIT,
        ),
    )(x, w, b.reshape(1, N).astype(jnp.float32))


def linear_add_ln(x, w, b, resid, gamma, beta, *, eps=LN_EPS,
                  out_dtype=jnp.bfloat16):
    """LayerNorm(x@w + b + resid). N (=hidden) kept whole for the LN reduction."""
    M, K = x.shape
    N = w.shape[1]
    TM = _pick_tile(M, 512, 16)
    TK = _pick_tile(K, 512, 128)
    grid = (M // TM, K // TK)
    kern = functools.partial(_matmul_add_ln_kernel, eps=eps)
    return pl.pallas_call(
        kern,
        out_shape=jax.ShapeDtypeStruct((M, N), out_dtype),
        grid_spec=pltpu.PrefetchScalarGridSpec(
            num_scalar_prefetch=0,
            grid=grid,
            in_specs=[
                pl.BlockSpec((TM, TK), lambda i, k: (i, k)),
                pl.BlockSpec((TK, N), lambda i, k: (k, 0)),
                pl.BlockSpec((1, N), lambda i, k: (0, 0)),
                pl.BlockSpec((TM, N), lambda i, k: (i, 0)),   # residual (k-invariant)
                pl.BlockSpec((1, N), lambda i, k: (0, 0)),
                pl.BlockSpec((1, N), lambda i, k: (0, 0)),
            ],
            out_specs=pl.BlockSpec((TM, N), lambda i, k: (i, 0)),
            scratch_shapes=[pltpu.VMEM((TM, N), jnp.float32)],
        ),
        compiler_params=pltpu.CompilerParams(
            dimension_semantics=("parallel", "arbitrary"),
            vmem_limit_bytes=VMEM_LIMIT,
        ),
    )(x, w, b.reshape(1, N).astype(jnp.float32), resid,
      gamma.reshape(1, N).astype(jnp.float32),
      beta.reshape(1, N).astype(jnp.float32))


def embed_add_layernorm(words, pos_type, gamma, beta, seq_len, *, eps=LN_EPS,
                        out_dtype=jnp.bfloat16):
    """LayerNorm(words + pos_type), words:(B*S,H) bf16, pos_type:(S,H) f32.

    The small (S, H) pos+type slab is broadcast across the batch via the
    index_map instead of materializing a (B, S, H) f32 tensor in HBM.
    """
    M, H = words.shape
    S = seq_len
    TM = _pick_tile(S, 512, 16)          # TM divides S so the wrap below is exact
    nb = S // TM
    kern = functools.partial(_add_ln_kernel, eps=eps)
    return pl.pallas_call(
        kern,
        out_shape=jax.ShapeDtypeStruct((M, H), out_dtype),
        grid_spec=pltpu.PrefetchScalarGridSpec(
            num_scalar_prefetch=0,
            grid=(M // TM,),
            in_specs=[
                pl.BlockSpec((TM, H), lambda i: (i, 0)),
                pl.BlockSpec((TM, H), lambda i: (i % nb, 0)),   # (S,H) slab wraps
                pl.BlockSpec((1, H), lambda i: (0, 0)),
                pl.BlockSpec((1, H), lambda i: (0, 0)),
            ],
            out_specs=pl.BlockSpec((TM, H), lambda i: (i, 0)),
        ),
        compiler_params=pltpu.CompilerParams(
            dimension_semantics=("parallel",),
            vmem_limit_bytes=VMEM_LIMIT,
        ),
    )(words, pos_type, gamma.reshape(1, H).astype(jnp.float32),
      beta.reshape(1, H).astype(jnp.float32))


def attention_out_ln(qkv, mask_f, wo, bo, resid, gamma, beta, *, n_heads,
                     head_dim, eps=LN_EPS, out_dtype=jnp.bfloat16):
    """Attention + fused output dense/residual/LayerNorm.

    qkv:(B*S, 3H) bf16, mask_f:(B,1,S) f32, wo:(H,H) bf16, resid:(B*S,H) bf16
    -> LayerNorm(context @ wo + bo + resid) as (B*S, H) bf16.
    Grid is (B, S // TQ): q-row tiling for pipelining / megacore sharding and
    a (TQ, S) (not (S, S)) transient score tile.
    """
    BS, H3 = qkv.shape
    H = H3 // 3
    B = mask_f.shape[0]
    S = BS // B
    TQ = _pick_tile(S, 256, 16)
    nq = S // TQ

    # Q rows: lane-aligned (TQ, H) column slice when H is a multiple of 128
    # (real BERT sizes); otherwise (toy shapes) take the full 3H columns.
    if H % 128 == 0:
        q_spec = pl.BlockSpec((TQ, H), lambda b, qi: (b * nq + qi, 0))
    else:
        q_spec = pl.BlockSpec((TQ, H3), lambda b, qi: (b * nq + qi, 0))

    kern = functools.partial(_attention_out_ln_kernel, n_heads=n_heads,
                             head_dim=head_dim, hidden=H, eps=eps,
                             exp_dtype=_EUP_DTYPE)
    # TODO(synk): for very long sequences (S >= ~2048, especially on v7x's
    # 64 MiB VMEM) a flash-style KV-tiled online softmax should replace the
    # whole-(S,3H) K/V block.
    return pl.pallas_call(
        kern,
        out_shape=jax.ShapeDtypeStruct((BS, H), out_dtype),
        grid_spec=pltpu.PrefetchScalarGridSpec(
            num_scalar_prefetch=0,
            grid=(B, nq),
            in_specs=[
                q_spec,
                pl.BlockSpec((S, H3), lambda b, qi: (b, 0)),     # K/V rows (qi-invariant)
                pl.BlockSpec((1, 1, S), lambda b, qi: (b, 0, 0)),
                pl.BlockSpec((H, H), lambda b, qi: (0, 0)),      # ao_w resident
                pl.BlockSpec((1, H), lambda b, qi: (0, 0)),
                pl.BlockSpec((TQ, H), lambda b, qi: (b * nq + qi, 0)),  # residual
                pl.BlockSpec((1, H), lambda b, qi: (0, 0)),
                pl.BlockSpec((1, H), lambda b, qi: (0, 0)),
            ],
            out_specs=pl.BlockSpec((TQ, H), lambda b, qi: (b * nq + qi, 0)),
        ),
        compiler_params=pltpu.CompilerParams(
            dimension_semantics=("parallel", "parallel"),
            vmem_limit_bytes=VMEM_LIMIT,
        ),
    )(qkv, qkv, mask_f, wo, bo.reshape(1, H).astype(jnp.float32), resid,
      gamma.reshape(1, H).astype(jnp.float32),
      beta.reshape(1, H).astype(jnp.float32))


# ------------------------------ BERT wrapper -------------------------------

def init_params(key, vocab_size, max_len, hidden, n_heads, inter, n_layers):
    def dense(k, fan_in, fan_out):
        k1, k2 = jax.random.split(k)
        w = 0.02 * jax.random.normal(k1, (fan_in, fan_out), jnp.float32)
        b = 0.02 * jax.random.normal(k2, (fan_out,), jnp.float32)
        return w, b

    keys = jax.random.split(key, 4 + n_layers)
    params = {
        "word_emb": 0.02 * jax.random.normal(keys[0], (vocab_size, hidden), jnp.float32),
        "pos_emb": 0.02 * jax.random.normal(keys[1], (max_len, hidden), jnp.float32),
        "type_emb": 0.02 * jax.random.normal(keys[2], (2, hidden), jnp.float32),
        "emb_ln_g": jnp.ones((hidden,), jnp.float32),
        "emb_ln_b": jnp.zeros((hidden,), jnp.float32),
        "layers": [],
    }
    for li in range(n_layers):
        lk = jax.random.split(keys[4 + li], 6)
        qw, qb = dense(lk[0], hidden, hidden)
        kw, kb = dense(lk[1], hidden, hidden)
        vw, vb = dense(lk[2], hidden, hidden)
        ow, ob = dense(lk[3], hidden, hidden)
        iw, ib = dense(lk[4], hidden, inter)
        fw, fb = dense(lk[5], inter, hidden)
        params["layers"].append(dict(
            q_w=qw, q_b=qb, k_w=kw, k_b=kb, v_w=vw, v_b=vb,
            ao_w=ow, ao_b=ob,
            a_ln_g=jnp.ones((hidden,), jnp.float32),
            a_ln_b=jnp.zeros((hidden,), jnp.float32),
            i_w=iw, i_b=ib, o_w=fw, o_b=fb,
            o_ln_g=jnp.ones((hidden,), jnp.float32),
            o_ln_b=jnp.zeros((hidden,), jnp.float32),
        ))
    return params


def fold_params(params):
    """Inference prep: fuse per-layer Q/K/V weights and cast MXU weights to bf16."""
    bf = lambda t: t.astype(jnp.bfloat16)
    out = {
        "word_emb": params["word_emb"],
        "pos_emb": params["pos_emb"],
        "type_emb": params["type_emb"],
        "emb_ln_g": params["emb_ln_g"],
        "emb_ln_b": params["emb_ln_b"],
        "layers": [],
    }
    for lp in params["layers"]:
        out["layers"].append(dict(
            qkv_w=bf(jnp.concatenate([lp["q_w"], lp["k_w"], lp["v_w"]], axis=1)),
            qkv_b=jnp.concatenate([lp["q_b"], lp["k_b"], lp["v_b"]]),
            ao_w=bf(lp["ao_w"]), ao_b=lp["ao_b"],
            a_ln_g=lp["a_ln_g"], a_ln_b=lp["a_ln_b"],
            i_w=bf(lp["i_w"]), i_b=lp["i_b"],
            o_w=bf(lp["o_w"]), o_b=lp["o_b"],
            o_ln_g=lp["o_ln_g"], o_ln_b=lp["o_ln_b"],
        ))
    return out


def bert_forward(params, input_ids, attention_mask, *, n_heads, enc_num):
    """Mirrors BERT.forward: returns (xs, inverted_bool_mask)."""
    B, S = input_ids.shape
    H = params["word_emb"].shape[1]
    Dh = H // n_heads

    if enc_num > 0:
        # --- embeddings (gather is XLA glue; sum + LayerNorm fused in Pallas) ---
        words = params["word_emb"][input_ids].astype(jnp.bfloat16)      # (B,S,H) bf16
        pos_type = params["pos_emb"][:S] + params["type_emb"][0]        # (S,H) f32
        x = embed_add_layernorm(
            words.reshape(B * S, H), pos_type,
            params["emb_ln_g"], params["emb_ln_b"], S,
        )                                                               # (B*S,H) bf16

        # Small (B,1,S) validity mask; the additive mask is built in-kernel.
        mask_f = attention_mask.astype(jnp.float32).reshape(B, 1, S)

        for lp in params["layers"][:enc_num]:
            qkv = linear(x, lp["qkv_w"], lp["qkv_b"])                   # (B*S,3H)
            attn_out = attention_out_ln(                                # attn+dense+res+LN
                qkv, mask_f, lp["ao_w"], lp["ao_b"], x,
                lp["a_ln_g"], lp["a_ln_b"], n_heads=n_heads, head_dim=Dh)
            inter = linear(attn_out, lp["i_w"], lp["i_b"], activation="gelu")
            x = linear_add_ln(inter, lp["o_w"], lp["o_b"], attn_out,
                              lp["o_ln_g"], lp["o_ln_b"])               # dense+res+LN

        xs = x.reshape(B, S, H).astype(jnp.float32)
    else:
        # enc_num == 0 path: raw word embeddings only (matches reference).
        xs = params["word_emb"][input_ids]

    inv_mask = jnp.logical_not(attention_mask.astype(bool))
    return xs, inv_mask


# ---------------------------------- main -----------------------------------

if __name__ == "__main__":
    # small, BERT-consistent shapes
    B, S = 2, 8
    HIDDEN = 32
    N_HEADS = 4
    INTER = 4 * HIDDEN
    VOCAB = 100
    MAX_LEN = 16
    ENC_NUM = 2

    key = jax.random.PRNGKey(0)
    k_param, k_ids = jax.random.split(key)

    params = init_params(k_param, VOCAB, MAX_LEN, HIDDEN, N_HEADS, INTER, ENC_NUM)
    iparams = fold_params(params)

    input_ids = jax.random.randint(k_ids, (B, S), 0, VOCAB, dtype=jnp.int32)
    # attention mask: 1 = valid token, 0 = padding (pad the tail of batch 1)
    attention_mask = jnp.ones((B, S), jnp.int32).at[1, -2:].set(0)

    fwd = jax.jit(functools.partial(bert_forward, n_heads=N_HEADS, enc_num=ENC_NUM))
    xs, out_mask = fwd(iparams, input_ids, attention_mask)
    jax.block_until_ready(xs)
    jax.block_until_ready(out_mask)

    assert xs.shape == (B, S, HIDDEN) and xs.dtype == jnp.float32
    assert out_mask.shape == (B, S) and out_mask.dtype == jnp.bool_
    print("KERNEL_OK")
</pallas_src>

<mosaic_0001>
module attributes {stable_mosaic.version = 11 : i64} {
  func.func @_add_ln_kernel(%arg0: i32, %arg1: memref<8x32xbf16, #tpu.memory_space<vmem>>, %arg2: memref<8x32xf32, #tpu.memory_space<vmem>>, %arg3: memref<1x32xf32, #tpu.memory_space<vmem>>, %arg4: memref<1x32xf32, #tpu.memory_space<vmem>>, %arg5: memref<8x32xbf16, #tpu.memory_space<vmem>>) attributes {dimension_semantics = [#tpu.dimension_semantics<parallel>], iteration_bounds = array<i64: 2>, scalar_prefetch = 0 : i64, scratch_operands = 0 : i64, tpu.core_type = #tpu.core_type<tc>, window_params = [{transform_indices = @transform_0, window_bounds = array<i64: 8, 32>}, {transform_indices = @transform_1, window_bounds = array<i64: 8, 32>}, {pipeline_mode = #tpu.pipeline_mode<synchronous>, transform_indices = @transform_2, window_bounds = array<i64: 1, 32>}, {pipeline_mode = #tpu.pipeline_mode<synchronous>, transform_indices = @transform_3, window_bounds = array<i64: 1, 32>}, {transform_indices = @transform_4, window_bounds = array<i64: 8, 32>}]} {
    %c0 = arith.constant 0 : index
    %c0_0 = arith.constant 0 : index
    %0 = vector.load %arg1[%c0, %c0_0] : memref<8x32xbf16, #tpu.memory_space<vmem>>, vector<8x32xbf16>
    %1 = arith.extf %0 : vector<8x32xbf16> to vector<8x32xf32>
    %c0_1 = arith.constant 0 : index
    %c0_2 = arith.constant 0 : index
    %2 = vector.load %arg2[%c0_1, %c0_2] : memref<8x32xf32, #tpu.memory_space<vmem>>, vector<8x32xf32>
    %3 = arith.addf %1, %2 : vector<8x32xf32>
    %cst = arith.constant dense<0.000000e+00> : vector<8xf32>
    %4 = vector.multi_reduction <add>, %3, %cst [1] : vector<8x32xf32> to vector<8xf32>
    %5 = vector.shape_cast %4 : vector<8xf32> to vector<8x1xf32>
    %cst_3 = arith.constant 3.200000e+01 : f32
    %6 = vector.broadcast %cst_3 : f32 to vector<8x1xf32>
    %7 = arith.divf %5, %6 : vector<8x1xf32>
    %8 = vector.broadcast %7 : vector<8x1xf32> to vector<8x32xf32>
    %9 = arith.subf %3, %8 : vector<8x32xf32>
    %10 = arith.mulf %9, %9 : vector<8x32xf32>
    %cst_4 = arith.constant dense<0.000000e+00> : vector<8xf32>
    %11 = vector.multi_reduction <add>, %10, %cst_4 [1] : vector<8x32xf32> to vector<8xf32>
    %12 = vector.shape_cast %11 : vector<8xf32> to vector<8x1xf32>
    %cst_5 = arith.constant 3.200000e+01 : f32
    %13 = vector.broadcast %cst_5 : f32 to vector<8x1xf32>
    %14 = arith.divf %12, %13 : vector<8x1xf32>
    %cst_6 = arith.constant 9.99999996E-13 : f32
    %15 = vector.broadcast %cst_6 : f32 to vector<8x1xf32>
    %16 = arith.addf %14, %15 : vector<8x1xf32>
    %17 = math.rsqrt %16 : vector<8x1xf32>
    %18 = vector.broadcast %17 : vector<8x1xf32> to vector<8x32xf32>
    %19 = arith.mulf %9, %18 : vector<8x32xf32>
    %c0_7 = arith.constant 0 : index
    %c0_8 = arith.constant 0 : index
    %20 = vector.load %arg3[%c0_7, %c0_8] : memref<1x32xf32, #tpu.memory_space<vmem>>, vector<1x32xf32>
    %21 = vector.broadcast %20 : vector<1x32xf32> to vector<8x32xf32>
    %22 = arith.mulf %19, %21 : vector<8x32xf32>
    %c0_9 = arith.constant 0 : index
    %c0_10 = arith.constant 0 : index
    %23 = vector.load %arg4[%c0_9, %c0_10] : memref<1x32xf32, #tpu.memory_space<vmem>>, vector<1x32xf32>
    %24 = vector.broadcast %23 : vector<1x32xf32> to vector<8x32xf32>
    %25 = arith.addf %22, %24 : vector<8x32xf32>
    %26 = arith.truncf %25 : vector<8x32xf32> to vector<8x32xbf16>
    %c0_11 = arith.constant 0 : index
    %c0_12 = arith.constant 0 : index
    %27 = vector.load %arg5[%c0_11, %c0_12] : memref<8x32xbf16, #tpu.memory_space<vmem>>, vector<8x32xbf16>
    tpu.vector_store %arg5[%c0_11, %c0_12], %26 {strides = array<i32>} : memref<8x32xbf16, #tpu.memory_space<vmem>>, vector<8x32xbf16>,
    return
  }
  func.func @transform_0(%arg0: i32) -> (i32, i32) {
    %c0_i32 = arith.constant 0 : i32
    %c0_i32_0 = arith.constant 0 : i32
    return %arg0, %c0_i32 : i32, i32
  }
  func.func @transform_1(%arg0: i32) -> (i32, i32) {
    %c1_i32 = arith.constant 1 : i32
    %c0_i32 = arith.constant 0 : i32
    %0 = arith.cmpi eq, %c1_i32, %c0_i32 : i32
    %c1_i32_0 = arith.constant 1 : i32
    %1 = arith.select %0, %c1_i32_0, %c1_i32 : i32
    %2 = arith.remsi %arg0, %1 : i32
    %c0_i32_1 = arith.constant 0 : i32
    %3 = arith.cmpi ne, %2, %c0_i32_1 : i32
    %c0_i32_2 = arith.constant 0 : i32
    %4 = arith.cmpi slt, %2, %c0_i32_2 : i32
    %c0_i32_3 = arith.constant 0 : i32
    %5 = arith.cmpi slt, %1, %c0_i32_3 : i32
    %6 = arith.xori %4, %5 : i1
    %7 = arith.andi %6, %3 : i1
    %8 = arith.addi %2, %1 : i32
    %9 = arith.select %7, %8, %2 : i32
    %c0_i32_4 = arith.constant 0 : i32
    %c0_i32_5 = arith.constant 0 : i32
    return %9, %c0_i32_4 : i32, i32
  }
  func.func @transform_2(%arg0: i32) -> (i32, i32) {
    %c0_i32 = arith.constant 0 : i32
    %c0_i32_0 = arith.constant 0 : i32
    %c0_i32_1 = arith.constant 0 : i32
    return %c0_i32, %c0_i32_0 : i32, i32
  }
  func.func @transform_3(%arg0: i32) -> (i32, i32) {
    %c0_i32 = arith.constant 0 : i32
    %c0_i32_0 = arith.constant 0 : i32
    %c0_i32_1 = arith.constant 0 : i32
    return %c0_i32, %c0_i32_0 : i32, i32
  }
  func.func @transform_4(%arg0: i32) -> (i32, i32) {
    %c0_i32 = arith.constant 0 : i32
    %c0_i32_0 = arith.constant 0 : i32
    return %arg0, %c0_i32 : i32, i32
  }
}

module attributes {stable_mosaic.version = 11 : i64} {
  func.func @_matmul_bias_kernel(%arg0: i32, %arg1: i32, %arg2: i32, %arg3: memref<16x32xbf16, #tpu.memory_space<vmem>>, %arg4: memref<32x96xbf16, #tpu.memory_space<vmem>>, %arg5: memref<1x96xf32, #tpu.memory_space<vmem>>, %arg6: memref<16x96xbf16, #tpu.memory_space<vmem>>, %arg7: memref<16x96xf32, #tpu.memory_space<vmem>>) attributes {dimension_semantics = [#tpu.dimension_semantics<parallel>, #tpu.dimension_semantics<parallel>, #tpu.dimension_semantics<arbitrary>], iteration_bounds = array<i64: 1, 1, 1>, scalar_prefetch = 0 : i64, scratch_operands = 1 : i64, tpu.core_type = #tpu.core_type<tc>, window_params = [{transform_indices = @transform_0, window_bounds = array<i64: 16, 32>}, {transform_indices = @transform_1, window_bounds = array<i64: 32, 96>}, {transform_indices = @transform_2, window_bounds = array<i64: 1, 96>}, {transform_indices = @transform_3, window_bounds = array<i64: 16, 96>}]} {
    %c0_i32 = arith.constant 0 : i32
    %0 = arith.cmpi eq, %arg2, %c0_i32 : i32
    %1 = arith.extui %0 : i1 to i32
    %c0_i32_0 = arith.constant 0 : i32
    %2 = arith.cmpi ne, %1, %c0_i32_0 : i32
    scf.if %2 {
      %cst_10 = arith.constant 0.000000e+00 : f32
      %12 = vector.broadcast %cst_10 : f32 to vector<16x96xf32>
      %c0_11 = arith.constant 0 : index
      %c0_12 = arith.constant 0 : index
      %13 = vector.load %arg7[%c0_11, %c0_12] : memref<16x96xf32, #tpu.memory_space<vmem>>, vector<16x96xf32>
      tpu.vector_store %arg7[%c0_11, %c0_12], %12 {strides = array<i32>} : memref<16x96xf32, #tpu.memory_space<vmem>>, vector<16x96xf32>,
    } else {
    }
    %c0 = arith.constant 0 : index
    %c0_1 = arith.constant 0 : index
    %3 = vector.load %arg7[%c0, %c0_1] : memref<16x96xf32, #tpu.memory_space<vmem>>, vector<16x96xf32>
    %c0_2 = arith.constant 0 : index
    %c0_3 = arith.constant 0 : index
    %4 = vector.load %arg3[%c0_2, %c0_3] : memref<16x32xbf16, #tpu.memory_space<vmem>>, vector<16x32xbf16>
    %c0_4 = arith.constant 0 : index
    %c0_5 = arith.constant 0 : index
    %5 = vector.load %arg4[%c0_4, %c0_5] : memref<32x96xbf16, #tpu.memory_space<vmem>>, vector<32x96xbf16>
    %cst = arith.constant dense<0.000000e+00> : vector<16x96xf32>
    %6 = tpu.matmul %4, %5, %cst {dimension_numbers = #tpu.dot_dimension_numbers<[1], [0], [0], [1], [0, 0, 1, 1], [], []>} : vector<16x32xbf16>, vector<32x96xbf16>, vector<16x96xf32> -> vector<16x96xf32>
    %7 = arith.addf %3, %6 : vector<16x96xf32>
    %c0_6 = arith.constant 0 : index
    %c0_7 = arith.constant 0 : index
    %8 = vector.load %arg7[%c0_6, %c0_7] : memref<16x96xf32, #tpu.memory_space<vmem>>, vector<16x96xf32>
    tpu.vector_store %arg7[%c0_6, %c0_7], %7 {strides = array<i32>} : memref<16x96xf32, #tpu.memory_space<vmem>>, vector<16x96xf32>,
    %c0_i32_8 = arith.constant 0 : i32
    %9 = arith.cmpi eq, %arg2, %c0_i32_8 : i32
    %10 = arith.extui %9 : i1 to i32
    %c0_i32_9 = arith.constant 0 : i32
    %11 = arith.cmpi ne, %10, %c0_i32_9 : i32
    scf.if %11 {
      %c0_10 = arith.constant 0 : index
      %c0_11 = arith.constant 0 : index
      %12 = vector.load %arg7[%c0_10, %c0_11] : memref<16x96xf32, #tpu.memory_space<vmem>>, vector<16x96xf32>
      %c0_12 = arith.constant 0 : index
      %c0_13 = arith.constant 0 : index
      %13 = vector.load %arg5[%c0_12, %c0_13] : memref<1x96xf32, #tpu.memory_space<vmem>>, vector<1x96xf32>
      %14 = vector.broadcast %13 : vector<1x96xf32> to vector<16x96xf32>
      %15 = arith.addf %12, %14 : vector<16x96xf32>
      %16 = arith.truncf %15 : vector<16x96xf32> to vector<16x96xbf16>
      %c0_14 = arith.constant 0 : index
      %c0_15 = arith.constant 0 : index
      %17 = vector.load %arg6[%c0_14, %c0_15] : memref<16x96xbf16, #tpu.memory_space<vmem>>, vector<16x96xbf16>
      tpu.vector_store %arg6[%c0_14, %c0_15], %16 {strides = array<i32>} : memref<16x96xbf16, #tpu.memory_space<vmem>>, vector<16x96xbf16>,
    } else {
    }
    return
  }
  func.func @transform_0(%arg0: i32, %arg1: i32, %arg2: i32) -> (i32, i32) {
    %c0_i32 = arith.constant 0 : i32
    return %arg0, %arg2 : i32, i32
  }
  func.func @transform_1(%arg0: i32, %arg1: i32, %arg2: i32) -> (i32, i32) {
    %c0_i32 = arith.constant 0 : i32
    return %arg2, %arg1 : i32, i32
  }
  func.func @transform_2(%arg0: i32, %arg1: i32, %arg2: i32) -> (i32, i32) {
    %c0_i32 = arith.constant 0 : i32
    %c0_i32_0 = arith.constant 0 : i32
    return %c0_i32, %arg1 : i32, i32
  }
  func.func @transform_3(%arg0: i32, %arg1: i32, %arg2: i32) -> (i32, i32) {
    %c0_i32 = arith.constant 0 : i32
    return %arg0, %arg1 : i32, i32
  }
}

module attributes {stable_mosaic.version = 11 : i64} {
  func.func @_matmul_bias_kernel(%arg0: i32, %arg1: i32, %arg2: i32, %arg3: memref<16x32xbf16, #tpu.memory_space<vmem>>, %arg4: memref<32x128xbf16, #tpu.memory_space<vmem>>, %arg5: memref<1x128xf32, #tpu.memory_space<vmem>>, %arg6: memref<16x128xbf16, #tpu.memory_space<vmem>>, %arg7: memref<16x128xf32, #tpu.memory_space<vmem>>) attributes {dimension_semantics = [#tpu.dimension_semantics<parallel>, #tpu.dimension_semantics<parallel>, #tpu.dimension_semantics<arbitrary>], iteration_bounds = array<i64: 1, 1, 1>, scalar_prefetch = 0 : i64, scratch_operands = 1 : i64, tpu.core_type = #tpu.core_type<tc>, window_params = [{transform_indices = @transform_0, window_bounds = array<i64: 16, 32>}, {transform_indices = @transform_1, window_bounds = array<i64: 32, 128>}, {transform_indices = @transform_2, window_bounds = array<i64: 1, 128>}, {transform_indices = @transform_3, window_bounds = array<i64: 16, 128>}]} {
    %c0_i32 = arith.constant 0 : i32
    %0 = arith.cmpi eq, %arg2, %c0_i32 : i32
    %1 = arith.extui %0 : i1 to i32
    %c0_i32_0 = arith.constant 0 : i32
    %2 = arith.cmpi ne, %1, %c0_i32_0 : i32
    scf.if %2 {
      %cst_10 = arith.constant 0.000000e+00 : f32
      %12 = vector.broadcast %cst_10 : f32 to vector<16x128xf32>
      %c0_11 = arith.constant 0 : index
      %c0_12 = arith.constant 0 : index
      %13 = vector.load %arg7[%c0_11, %c0_12] : memref<16x128xf32, #tpu.memory_space<vmem>>, vector<16x128xf32>
      tpu.vector_store %arg7[%c0_11, %c0_12], %12 {strides = array<i32>} : memref<16x128xf32, #tpu.memory_space<vmem>>, vector<16x128xf32>,
    } else {
    }
    %c0 = arith.constant 0 : index
    %c0_1 = arith.constant 0 : index
    %3 = vector.load %arg7[%c0, %c0_1] : memref<16x128xf32, #tpu.memory_space<vmem>>, vector<16x128xf32>
    %c0_2 = arith.constant 0 : index
    %c0_3 = arith.constant 0 : index
    %4 = vector.load %arg3[%c0_2, %c0_3] : memref<16x32xbf16, #tpu.memory_space<vmem>>, vector<16x32xbf16>
    %c0_4 = arith.constant 0 : index
    %c0_5 = arith.constant 0 : index
    %5 = vector.load %arg4[%c0_4, %c0_5] : memref<32x128xbf16, #tpu.memory_space<vmem>>, vector<32x128xbf16>
    %cst = arith.constant dense<0.000000e+00> : vector<16x128xf32>
    %6 = tpu.matmul %4, %5, %cst {dimension_numbers = #tpu.dot_dimension_numbers<[1], [0], [0], [1], [0, 0, 1, 1], [], []>} : vector<16x32xbf16>, vector<32x128xbf16>, vector<16x128xf32> -> vector<16x128xf32>
    %7 = arith.addf %3, %6 : vector<16x128xf32>
    %c0_6 = arith.constant 0 : index
    %c0_7 = arith.constant 0 : index
    %8 = vector.load %arg7[%c0_6, %c0_7] : memref<16x128xf32, #tpu.memory_space<vmem>>, vector<16x128xf32>
    tpu.vector_store %arg7[%c0_6, %c0_7], %7 {strides = array<i32>} : memref<16x128xf32, #tpu.memory_space<vmem>>, vector<16x128xf32>,
    %c0_i32_8 = arith.constant 0 : i32
    %9 = arith.cmpi eq, %arg2, %c0_i32_8 : i32
    %10 = arith.extui %9 : i1 to i32
    %c0_i32_9 = arith.constant 0 : i32
    %11 = arith.cmpi ne, %10, %c0_i32_9 : i32
    scf.if %11 {
      %c0_10 = arith.constant 0 : index
      %c0_11 = arith.constant 0 : index
      %12 = vector.load %arg7[%c0_10, %c0_11] : memref<16x128xf32, #tpu.memory_space<vmem>>, vector<16x128xf32>
      %c0_12 = arith.constant 0 : index
      %c0_13 = arith.constant 0 : index
      %13 = vector.load %arg5[%c0_12, %c0_13] : memref<1x128xf32, #tpu.memory_space<vmem>>, vector<1x128xf32>
      %14 = vector.broadcast %13 : vector<1x128xf32> to vector<16x128xf32>
      %15 = arith.addf %12, %14 : vector<16x128xf32>
      %16 = arith.truncf %15 : vector<16x128xf32> to vector<16x128xbf16>
      %17 = arith.mulf %16, %16 : vector<16x128xbf16>
      %18 = arith.mulf %17, %16 : vector<16x128xbf16>
      %cst_14 = arith.constant 4.467770e-02 : bf16
      %19 = vector.broadcast %cst_14 : bf16 to vector<16x128xbf16>
      %20 = arith.mulf %19, %18 : vector<16x128xbf16>
      %21 = arith.addf %16, %20 : vector<16x128xbf16>
      %cst_15 = arith.constant 7.968750e-01 : bf16
      %22 = vector.broadcast %cst_15 : bf16 to vector<16x128xbf16>
      %23 = arith.mulf %22, %21 : vector<16x128xbf16>
      %24 = math.tanh %23 : vector<16x128xbf16>
      %cst_16 = arith.constant 5.000000e-01 : f32
      %25 = vector.broadcast %cst_16 : f32 to vector<16x128xf32>
      %26 = arith.mulf %25, %15 : vector<16x128xf32>
      %27 = arith.extf %24 : vector<16x128xbf16> to vector<16x128xf32>
      %cst_17 = arith.constant 1.000000e+00 : f32
      %28 = vector.broadcast %cst_17 : f32 to vector<16x128xf32>
      %29 = arith.addf %28, %27 : vector<16x128xf32>
      %30 = arith.mulf %26, %29 : vector<16x128xf32>
      %31 = arith.truncf %30 : vector<16x128xf32> to vector<16x128xbf16>
      %c0_18 = arith.constant 0 : index
      %c0_19 = arith.constant 0 : index
      %32 = vector.load %arg6[%c0_18, %c0_19] : memref<16x128xbf16, #tpu.memory_space<vmem>>, vector<16x128xbf16>
      tpu.vector_store %arg6[%c0_18, %c0_19], %31 {strides = array<i32>} : memref<16x128xbf16, #tpu.memory_space<vmem>>, vector<16x128xbf16>,
    } else {
    }
    return
  }
  func.func @transform_0(%arg0: i32, %arg1: i32, %arg2: i32) -> (i32, i32) {
    %c0_i32 = arith.constant 0 : i32
    return %arg0, %arg2 : i32, i32
  }
  func.func @transform_1(%arg0: i32, %arg1: i32, %arg2: i32) -> (i32, i32) {
    %c0_i32 = arith.constant 0 : i32
    return %arg2, %arg1 : i32, i32
  }
  func.func @transform_2(%arg0: i32, %arg1: i32, %arg2: i32) -> (i32, i32) {
    %c0_i32 = arith.constant 0 : i32
    %c0_i32_0 = arith.constant 0 : i32
    return %c0_i32, %arg1 : i32, i32
  }
  func.func @transform_3(%arg0: i32, %arg1: i32, %arg2: i32) -> (i32, i32) {
    %c0_i32 = arith.constant 0 : i32
    return %arg0, %arg1 : i32, i32
  }
}

module attributes {stable_mosaic.version = 11 : i64} {
  func.func @_attention_out_ln_kernel(%arg0: i32, %arg1: i32, %arg2: memref<8x96xbf16, #tpu.memory_space<vmem>>, %arg3: memref<8x96xbf16, #tpu.memory_space<vmem>>, %arg4: memref<1x1x8xf32, #tpu.memory_space<vmem>>, %arg5: memref<32x32xbf16, #tpu.memory_space<vmem>>, %arg6: memref<1x32xf32, #tpu.memory_space<vmem>>, %arg7: memref<8x32xbf16, #tpu.memory_space<vmem>>, %arg8: memref<1x32xf32, #tpu.memory_space<vmem>>, %arg9: memref<1x32xf32, #tpu.memory_space<vmem>>, %arg10: memref<8x32xbf16, #tpu.memory_space<vmem>>) attributes {dimension_semantics = [#tpu.dimension_semantics<parallel>, #tpu.dimension_semantics<parallel>], iteration_bounds = array<i64: 2, 1>, scalar_prefetch = 0 : i64, scratch_operands = 0 : i64, tpu.core_type = #tpu.core_type<tc>, window_params = [{transform_indices = @transform_0, window_bounds = array<i64: 8, 96>}, {transform_indices = @transform_1, window_bounds = array<i64: 8, 96>}, {transform_indices = @transform_2, window_bounds = array<i64: 1, 1, 8>}, {pipeline_mode = #tpu.pipeline_mode<synchronous>, transform_indices = @transform_3, window_bounds = array<i64: 32, 32>}, {pipeline_mode = #tpu.pipeline_mode<synchronous>, transform_indices = @transform_4, window_bounds = array<i64: 1, 32>}, {transform_indices = @transform_5, window_bounds = array<i64: 8, 32>}, {pipeline_mode = #tpu.pipeline_mode<synchronous>, transform_indices = @transform_6, window_bounds = array<i64: 1, 32>}, {pipeline_mode = #tpu.pipeline_mode<synchronous>, transform_indices = @transform_7, window_bounds = array<i64: 1, 32>}, {transform_indices = @transform_8, window_bounds = array<i64: 8, 32>}]} {
    %c0 = arith.constant 0 : index
    %c0_0 = arith.constant 0 : index
    %c0_1 = arith.constant 0 : index
    %0 = vector.load %arg4[%c0, %c0_0, %c0_1] : memref<1x1x8xf32, #tpu.memory_space<vmem>>, vector<1x1x8xf32>
    %1 = vector.shape_cast %0 : vector<1x1x8xf32> to vector<1x8xf32>
    %cst = arith.constant 1.000000e+00 : f32
    %2 = vector.broadcast %cst : f32 to vector<1x8xf32>
    %3 = arith.subf %2, %1 : vector<1x8xf32>
    %cst_2 = arith.constant -1.000000e+04 : f32
    %4 = vector.broadcast %cst_2 : f32 to vector<1x8xf32>
    %5 = arith.mulf %3, %4 : vector<1x8xf32>
    %c0_3 = arith.constant 0 : index
    %c0_4 = arith.constant 0 : index
    %6 = vector.load %arg2[%c0_3, %c0_4] : memref<8x96xbf16, #tpu.memory_space<vmem>>, vector<8x8xbf16>
    %cst_5 = arith.constant 3.535160e-01 : bf16
    %7 = vector.broadcast %cst_5 : bf16 to vector<8x8xbf16>
    %8 = arith.mulf %6, %7 : vector<8x8xbf16>
    %c0_6 = arith.constant 0 : index
    %c32 = arith.constant 32 : index
    %9 = vector.load %arg3[%c0_6, %c32] : memref<8x96xbf16, #tpu.memory_space<vmem>>, vector<8x8xbf16>
    %c0_7 = arith.constant 0 : index
    %c64 = arith.constant 64 : index
    %10 = vector.load %arg3[%c0_7, %c64] : memref<8x96xbf16, #tpu.memory_space<vmem>>, vector<8x8xbf16>
    %cst_8 = arith.constant dense<0.000000e+00> : vector<8x8xf32>
    %11 = tpu.matmul %8, %9, %cst_8 {dimension_numbers = #tpu.dot_dimension_numbers<[1], [1], [0], [0], [0, 0, 1, 0], [], []>} : vector<8x8xbf16>, vector<8x8xbf16>, vector<8x8xf32> -> vector<8x8xf32>
    %12 = vector.broadcast %5 : vector<1x8xf32> to vector<8x8xf32>
    %13 = arith.addf %11, %12 : vector<8x8xf32>
    %cst_9 = arith.constant dense<0xFF800000> : vector<8xf32>
    %14 = vector.multi_reduction <maximumf>, %13, %cst_9 [1] : vector<8x8xf32> to vector<8xf32>
    %15 = vector.shape_cast %14 : vector<8xf32> to vector<8x1xf32>
    %16 = vector.broadcast %15 : vector<8x1xf32> to vector<8x8xf32>
    %17 = arith.subf %13, %16 : vector<8x8xf32>
    %18 = arith.truncf %17 : vector<8x8xf32> to vector<8x8xbf16>
    %19 = math.exp %18 : vector<8x8xbf16>
    %20 = arith.extf %19 : vector<8x8xbf16> to vector<8x8xf32>
    %cst_10 = arith.constant dense<0.000000e+00> : vector<8xf32>
    %21 = vector.multi_reduction <add>, %20, %cst_10 [1] : vector<8x8xf32> to vector<8xf32>
    %22 = vector.shape_cast %21 : vector<8xf32> to vector<8x1xf32>
    %23 = tpu.reciprocal %22 {approx = true} : vector<8x1xf32> -> vector<8x1xf32>
    %cst_11 = arith.constant dense<0.000000e+00> : vector<8x8xf32>
    %24 = tpu.matmul %19, %10, %cst_11 {dimension_numbers = #tpu.dot_dimension_numbers<[1], [0], [0], [1], [0, 0, 1, 1], [], []>} : vector<8x8xbf16>, vector<8x8xbf16>, vector<8x8xf32> -> vector<8x8xf32>
    %25 = vector.broadcast %23 : vector<8x1xf32> to vector<8x8xf32>
    %26 = arith.mulf %24, %25 : vector<8x8xf32>
    %c0_12 = arith.constant 0 : index
    %c8 = arith.constant 8 : index
    %27 = vector.load %arg2[%c0_12, %c8] : memref<8x96xbf16, #tpu.memory_space<vmem>>, vector<8x8xbf16>
    %cst_13 = arith.constant 3.535160e-01 : bf16
    %28 = vector.broadcast %cst_13 : bf16 to vector<8x8xbf16>
    %29 = arith.mulf %27, %28 : vector<8x8xbf16>
    %c0_14 = arith.constant 0 : index
    %c40 = arith.constant 40 : index
    %30 = vector.load %arg3[%c0_14, %c40] : memref<8x96xbf16, #tpu.memory_space<vmem>>, vector<8x8xbf16>
    %c0_15 = arith.constant 0 : index
    %c72 = arith.constant 72 : index
    %31 = vector.load %arg3[%c0_15, %c72] : memref<8x96xbf16, #tpu.memory_space<vmem>>, vector<8x8xbf16>
    %cst_16 = arith.constant dense<0.000000e+00> : vector<8x8xf32>
    %32 = tpu.matmul %29, %30, %cst_16 {dimension_numbers = #tpu.dot_dimension_numbers<[1], [1], [0], [0], [0, 0, 1, 0], [], []>} : vector<8x8xbf16>, vector<8x8xbf16>, vector<8x8xf32> -> vector<8x8xf32>
    %33 = vector.broadcast %5 : vector<1x8xf32> to vector<8x8xf32>
    %34 = arith.addf %32, %33 : vector<8x8xf32>
    %cst_17 = arith.constant dense<0xFF800000> : vector<8xf32>
    %35 = vector.multi_reduction <maximumf>, %34, %cst_17 [1] : vector<8x8xf32> to vector<8xf32>
    %36 = vector.shape_cast %35 : vector<8xf32> to vector<8x1xf32>
    %37 = vector.broadcast %36 : vector<8x1xf32> to vector<8x8xf32>
    %38 = arith.subf %34, %37 : vector<8x8xf32>
    %39 = arith.truncf %38 : vector<8x8xf32> to vector<8x8xbf16>
    %40 = math.exp %39 : vector<8x8xbf16>
    %41 = arith.extf %40 : vector<8x8xbf16> to vector<8x8xf32>
    %cst_18 = arith.constant dense<0.000000e+00> : vector<8xf32>
    %42 = vector.multi_reduction <add>, %41, %cst_18 [1] : vector<8x8xf32> to vector<8xf32>
    %43 = vector.shape_cast %42 : vector<8xf32> to vector<8x1xf32>
    %44 = tpu.reciprocal %43 {approx = true} : vector<8x1xf32> -> vector<8x1xf32>
    %cst_19 = arith.constant dense<0.000000e+00> : vector<8x8xf32>
    %45 = tpu.matmul %40, %31, %cst_19 {dimension_numbers = #tpu.dot_dimension_numbers<[1], [0], [0], [1], [0, 0, 1, 1], [], []>} : vector<8x8xbf16>, vector<8x8xbf16>, vector<8x8xf32> -> vector<8x8xf32>
    %46 = vector.broadcast %44 : vector<8x1xf32> to vector<8x8xf32>
    %47 = arith.mulf %45, %46 : vector<8x8xf32>
    %c0_20 = arith.constant 0 : index
    %c16 = arith.constant 16 : index
    %48 = vector.load %arg2[%c0_20, %c16] : memref<8x96xbf16, #tpu.memory_space<vmem>>, vector<8x8xbf16>
    %cst_21 = arith.constant 3.535160e-01 : bf16
    %49 = vector.broadcast %cst_21 : bf16 to vector<8x8xbf16>
    %50 = arith.mulf %48, %49 : vector<8x8xbf16>
    %c0_22 = arith.constant 0 : index
    %c48 = arith.constant 48 : index
    %51 = vector.load %arg3[%c0_22, %c48] : memref<8x96xbf16, #tpu.memory_space<vmem>>, vector<8x8xbf16>
    %c0_23 = arith.constant 0 : index
    %c80 = arith.constant 80 : index
    %52 = vector.load %arg3[%c0_23, %c80] : memref<8x96xbf16, #tpu.memory_space<vmem>>, vector<8x8xbf16>
    %cst_24 = arith.constant dense<0.000000e+00> : vector<8x8xf32>
    %53 = tpu.matmul %50, %51, %cst_24 {dimension_numbers = #tpu.dot_dimension_numbers<[1], [1], [0], [0], [0, 0, 1, 0], [], []>} : vector<8x8xbf16>, vector<8x8xbf16>, vector<8x8xf32> -> vector<8x8xf32>
    %54 = vector.broadcast %5 : vector<1x8xf32> to vector<8x8xf32>
    %55 = arith.addf %53, %54 : vector<8x8xf32>
    %cst_25 = arith.constant dense<0xFF800000> : vector<8xf32>
    %56 = vector.multi_reduction <maximumf>, %55, %cst_25 [1] : vector<8x8xf32> to vector<8xf32>
    %57 = vector.shape_cast %56 : vector<8xf32> to vector<8x1xf32>
    %58 = vector.broadcast %57 : vector<8x1xf32> to vector<8x8xf32>
    %59 = arith.subf %55, %58 : vector<8x8xf32>
    %60 = arith.truncf %59 : vector<8x8xf32> to vector<8x8xbf16>
    %61 = math.exp %60 : vector<8x8xbf16>
    %62 = arith.extf %61 : vector<8x8xbf16> to vector<8x8xf32>
    %cst_26 = arith.constant dense<0.000000e+00> : vector<8xf32>
    %63 = vector.multi_reduction <add>, %62, %cst_26 [1] : vector<8x8xf32> to vector<8xf32>
    %64 = vector.shape_cast %63 : vector<8xf32> to vector<8x1xf32>
    %65 = tpu.reciprocal %64 {approx = true} : vector<8x1xf32> -> vector<8x1xf32>
    %cst_27 = arith.constant dense<0.000000e+00> : vector<8x8xf32>
    %66 = tpu.matmul %61, %52, %cst_27 {dimension_numbers = #tpu.dot_dimension_numbers<[1], [0], [0], [1], [0, 0, 1, 1], [], []>} : vector<8x8xbf16>, vector<8x8xbf16>, vector<8x8xf32> -> vector<8x8xf32>
    %67 = vector.broadcast %65 : vector<8x1xf32> to vector<8x8xf32>
    %68 = arith.mulf %66, %67 : vector<8x8xf32>
    %c0_28 = arith.constant 0 : index
    %c24 = arith.constant 24 : index
    %69 = vector.load %arg2[%c0_28, %c24] : memref<8x96xbf16, #tpu.memory_space<vmem>>, vector<8x8xbf16>
    %cst_29 = arith.constant 3.535160e-01 : bf16
    %70 = vector.broadcast %cst_29 : bf16 to vector<8x8xbf16>
    %71 = arith.mulf %69, %70 : vector<8x8xbf16>
    %c0_30 = arith.constant 0 : index
    %c56 = arith.constant 56 : index
    %72 = vector.load %arg3[%c0_30, %c56] : memref<8x96xbf16, #tpu.memory_space<vmem>>, vector<8x8xbf16>
    %c0_31 = arith.constant 0 : index
    %c88 = arith.constant 88 : index
    %73 = vector.load %arg3[%c0_31, %c88] : memref<8x96xbf16, #tpu.memory_space<vmem>>, vector<8x8xbf16>
    %cst_32 = arith.constant dense<0.000000e+00> : vector<8x8xf32>
    %74 = tpu.matmul %71, %72, %cst_32 {dimension_numbers = #tpu.dot_dimension_numbers<[1], [1], [0], [0], [0, 0, 1, 0], [], []>} : vector<8x8xbf16>, vector<8x8xbf16>, vector<8x8xf32> -> vector<8x8xf32>
    %75 = vector.broadcast %5 : vector<1x8xf32> to vector<8x8xf32>
    %76 = arith.addf %74, %75 : vector<8x8xf32>
    %cst_33 = arith.constant dense<0xFF800000> : vector<8xf32>
    %77 = vector.multi_reduction <maximumf>, %76, %cst_33 [1] : vector<8x8xf32> to vector<8xf32>
    %78 = vector.shape_cast %77 : vector<8xf32> to vector<8x1xf32>
    %79 = vector.broadcast %78 : vector<8x1xf32> to vector<8x8xf32>
    %80 = arith.subf %76, %79 : vector<8x8xf32>
    %81 = arith.truncf %80 : vector<8x8xf32> to vector<8x8xbf16>
    %82 = math.exp %81 : vector<8x8xbf16>
    %83 = arith.extf %82 : vector<8x8xbf16> to vector<8x8xf32>
    %cst_34 = arith.constant dense<0.000000e+00> : vector<8xf32>
    %84 = vector.multi_reduction <add>, %83, %cst_34 [1] : vector<8x8xf32> to vector<8xf32>
    %85 = vector.shape_cast %84 : vector<8xf32> to vector<8x1xf32>
    %86 = tpu.reciprocal %85 {approx = true} : vector<8x1xf32> -> vector<8x1xf32>
    %cst_35 = arith.constant dense<0.000000e+00> : vector<8x8xf32>
    %87 = tpu.matmul %82, %73, %cst_35 {dimension_numbers = #tpu.dot_dimension_numbers<[1], [0], [0], [1], [0, 0, 1, 1], [], []>} : vector<8x8xbf16>, vector<8x8xbf16>, vector<8x8xf32> -> vector<8x8xf32>
    %88 = vector.broadcast %86 : vector<8x1xf32> to vector<8x8xf32>
    %89 = arith.mulf %87, %88 : vector<8x8xf32>
    %90 = tpu.concatenate %26, %47, %68, %89 in 1 : vector<8x8xf32>, vector<8x8xf32>, vector<8x8xf32>, vector<8x8xf32> -> vector<8x32xf32>
    %91 = arith.truncf %90 : vector<8x32xf32> to vector<8x32xbf16>
    %c0_36 = arith.constant 0 : index
    %c0_37 = arith.constant 0 : index
    %92 = vector.load %arg5[%c0_36, %c0_37] : memref<32x32xbf16, #tpu.memory_space<vmem>>, vector<32x32xbf16>
    %cst_38 = arith.constant dense<0.000000e+00> : vector<8x32xf32>
    %93 = tpu.matmul %91, %92, %cst_38 {dimension_numbers = #tpu.dot_dimension_numbers<[1], [0], [0], [1], [0, 0, 1, 1], [], []>} : vector<8x32xbf16>, vector<32x32xbf16>, vector<8x32xf32> -> vector<8x32xf32>
    %c0_39 = arith.constant 0 : index
    %c0_40 = arith.constant 0 : index
    %94 = vector.load %arg6[%c0_39, %c0_40] : memref<1x32xf32, #tpu.memory_space<vmem>>, vector<1x32xf32>
    %95 = vector.broadcast %94 : vector<1x32xf32> to vector<8x32xf32>
    %96 = arith.addf %93, %95 : vector<8x32xf32>
    %c0_41 = arith.constant 0 : index
    %c0_42 = arith.constant 0 : index
    %97 = vector.load %arg7[%c0_41, %c0_42] : memref<8x32xbf16, #tpu.memory_space<vmem>>, vector<8x32xbf16>
    %98 = arith.extf %97 : vector<8x32xbf16> to vector<8x32xf32>
    %99 = arith.addf %96, %98 : vector<8x32xf32>
    %cst_43 = arith.constant dense<0.000000e+00> : vector<8xf32>
    %100 = vector.multi_reduction <add>, %99, %cst_43 [1] : vector<8x32xf32> to vector<8xf32>
    %101 = vector.shape_cast %100 : vector<8xf32> to vector<8x1xf32>
    %cst_44 = arith.constant 3.200000e+01 : f32
    %102 = vector.broadcast %cst_44 : f32 to vector<8x1xf32>
    %103 = arith.divf %101, %102 : vector<8x1xf32>
    %104 = vector.broadcast %103 : vector<8x1xf32> to vector<8x32xf32>
    %105 = arith.subf %99, %104 : vector<8x32xf32>
    %106 = arith.mulf %105, %105 : vector<8x32xf32>
    %cst_45 = arith.constant dense<0.000000e+00> : vector<8xf32>
    %107 = vector.multi_reduction <add>, %106, %cst_45 [1] : vector<8x32xf32> to vector<8xf32>
    %108 = vector.shape_cast %107 : vector<8xf32> to vector<8x1xf32>
    %cst_46 = arith.constant 3.200000e+01 : f32
    %109 = vector.broadcast %cst_46 : f32 to vector<8x1xf32>
    %110 = arith.divf %108, %109 : vector<8x1xf32>
    %cst_47 = arith.constant 9.99999996E-13 : f32
    %111 = vector.broadcast %cst_47 : f32 to vector<8x1xf32>
    %112 = arith.addf %110, %111 : vector<8x1xf32>
    %113 = math.rsqrt %112 : vector<8x1xf32>
    %114 = vector.broadcast %113 : vector<8x1xf32> to vector<8x32xf32>
    %115 = arith.mulf %105, %114 : vector<8x32xf32>
    %c0_48 = arith.constant 0 : index
    %c0_49 = arith.constant 0 : index
    %116 = vector.load %arg8[%c0_48, %c0_49] : memref<1x32xf32, #tpu.memory_space<vmem>>, vector<1x32xf32>
    %117 = vector.broadcast %116 : vector<1x32xf32> to vector<8x32xf32>
    %118 = arith.mulf %115, %117 : vector<8x32xf32>
    %c0_50 = arith.constant 0 : index
    %c0_51 = arith.constant 0 : index
    %119 = vector.load %arg9[%c0_50, %c0_51] : memref<1x32xf32, #tpu.memory_space<vmem>>, vector<1x32xf32>
    %120 = vector.broadcast %119 : vector<1x32xf32> to vector<8x32xf32>
    %121 = arith.addf %118, %120 : vector<8x32xf32>
    %122 = arith.truncf %121 : vector<8x32xf32> to vector<8x32xbf16>
    %c0_52 = arith.constant 0 : index
    %c0_53 = arith.constant 0 : index
    %123 = vector.load %arg10[%c0_52, %c0_53] : memref<8x32xbf16, #tpu.memory_space<vmem>>, vector<8x32xbf16>
    tpu.vector_store %arg10[%c0_52, %c0_53], %122 {strides = array<i32>} : memref<8x32xbf16, #tpu.memory_space<vmem>>, vector<8x32xbf16>,
    return
  }
  func.func @transform_0(%arg0: i32, %arg1: i32) -> (i32, i32) {
    %c1_i32 = arith.constant 1 : i32
    %0 = arith.muli %arg0, %c1_i32 : i32
    %1 = arith.addi %0, %arg1 : i32
    %c0_i32 = arith.constant 0 : i32
    %c0_i32_0 = arith.constant 0 : i32
    return %1, %c0_i32 : i32, i32
  }
  func.func @transform_1(%arg0: i32, %arg1: i32) -> (i32, i32) {
    %c0_i32 = arith.constant 0 : i32
    %c0_i32_0 = arith.constant 0 : i32
    return %arg0, %c0_i32 : i32, i32
  }
  func.func @transform_2(%arg0: i32, %arg1: i32) -> (i32, i32, i32) {
    %c0_i32 = arith.constant 0 : i32
    %c0_i32_0 = arith.constant 0 : i32
    %c0_i32_1 = arith.constant 0 : i32
    return %arg0, %c0_i32, %c0_i32_0 : i32, i32, i32
  }
  func.func @transform_3(%arg0: i32, %arg1: i32) -> (i32, i32) {
    %c0_i32 = arith.constant 0 : i32
    %c0_i32_0 = arith.constant 0 : i32
    %c0_i32_1 = arith.constant 0 : i32
    return %c0_i32, %c0_i32_0 : i32, i32
  }
  func.func @transform_4(%arg0: i32, %arg1: i32) -> (i32, i32) {
    %c0_i32 = arith.constant 0 : i32
    %c0_i32_0 = arith.constant 0 : i32
    %c0_i32_1 = arith.constant 0 : i32
    return %c0_i32, %c0_i32_0 : i32, i32
  }
  func.func @transform_5(%arg0: i32, %arg1: i32) -> (i32, i32) {
    %c1_i32 = arith.constant 1 : i32
    %0 = arith.muli %arg0, %c1_i32 : i32
    %1 = arith.addi %0, %arg1 : i32
    %c0_i32 = arith.constant 0 : i32
    %c0_i32_0 = arith.constant 0 : i32
    return %1, %c0_i32 : i32, i32
  }
  func.func @transform_6(%arg0: i32, %arg1: i32) -> (i32, i32) {
    %c0_i32 = arith.constant 0 : i32
    %c0_i32_0 = arith.constant 0 : i32
    %c0_i32_1 = arith.constant 0 : i32
    return %c0_i32, %c0_i32_0 : i32, i32
  }
  func.func @transform_7(%arg0: i32, %arg1: i32) -> (i32, i32) {
    %c0_i32 = arith.constant 0 : i32
    %c0_i32_0 = arith.constant 0 : i32
    %c0_i32_1 = arith.constant 0 : i32
    return %c0_i32, %c0_i32_0 : i32, i32
  }
  func.func @transform_8(%arg0: i32, %arg1: i32) -> (i32, i32) {
    %c1_i32 = arith.constant 1 : i32
    %0 = arith.muli %arg0, %c1_i32 : i32
    %1 = arith.addi %0, %arg1 : i32
    %c0_i32 = arith.constant 0 : i32
    %c0_i32_0 = arith.constant 0 : i32
    return %1, %c0_i32 : i32, i32
  }
}

module attributes {stable_mosaic.version = 11 : i64} {
  func.func @_matmul_add_ln_kernel(%arg0: i32, %arg1: i32, %arg2: memref<16x128xbf16, #tpu.memory_space<vmem>>, %arg3: memref<128x32xbf16, #tpu.memory_space<vmem>>, %arg4: memref<1x32xf32, #tpu.memory_space<vmem>>, %arg5: memref<16x32xbf16, #tpu.memory_space<vmem>>, %arg6: memref<1x32xf32, #tpu.memory_space<vmem>>, %arg7: memref<1x32xf32, #tpu.memory_space<vmem>>, %arg8: memref<16x32xbf16, #tpu.memory_space<vmem>>, %arg9: memref<16x32xf32, #tpu.memory_space<vmem>>) attributes {dimension_semantics = [#tpu.dimension_semantics<parallel>, #tpu.dimension_semantics<arbitrary>], iteration_bounds = array<i64: 1, 1>, scalar_prefetch = 0 : i64, scratch_operands = 1 : i64, tpu.core_type = #tpu.core_type<tc>, window_params = [{transform_indices = @transform_0, window_bounds = array<i64: 16, 128>}, {transform_indices = @transform_1, window_bounds = array<i64: 128, 32>}, {pipeline_mode = #tpu.pipeline_mode<synchronous>, transform_indices = @transform_2, window_bounds = array<i64: 1, 32>}, {transform_indices = @transform_3, window_bounds = array<i64: 16, 32>}, {pipeline_mode = #tpu.pipeline_mode<synchronous>, transform_indices = @transform_4, window_bounds = array<i64: 1, 32>}, {pipeline_mode = #tpu.pipeline_mode<synchronous>, transform_indices = @transform_5, window_bounds = array<i64: 1, 32>}, {transform_indices = @transform_6, window_bounds = array<i64: 16, 32>}]} {
    %c0_i32 = arith.constant 0 : i32
    %0 = arith.cmpi eq, %arg1, %c0_i32 : i32
    %1 = arith.extui %0 : i1 to i32
    %c0_i32_0 = arith.constant 0 : i32
    %2 = arith.cmpi ne, %1, %c0_i32_0 : i32
    scf.if %2 {
      %cst_10 = arith.constant 0.000000e+00 : f32
      %12 = vector.broadcast %cst_10 : f32 to vector<16x32xf32>
      %c0_11 = arith.constant 0 : index
      %c0_12 = arith.constant 0 : index
      %13 = vector.load %arg9[%c0_11, %c0_12] : memref<16x32xf32, #tpu.memory_space<vmem>>, vector<16x32xf32>
      tpu.vector_store %arg9[%c0_11, %c0_12], %12 {strides = array<i32>} : memref<16x32xf32, #tpu.memory_space<vmem>>, vector<16x32xf32>,
    } else {
    }
    %c0 = arith.constant 0 : index
    %c0_1 = arith.constant 0 : index
    %3 = vector.load %arg9[%c0, %c0_1] : memref<16x32xf32, #tpu.memory_space<vmem>>, vector<16x32xf32>
    %c0_2 = arith.constant 0 : index
    %c0_3 = arith.constant 0 : index
    %4 = vector.load %arg2[%c0_2, %c0_3] : memref<16x128xbf16, #tpu.memory_space<vmem>>, vector<16x128xbf16>
    %c0_4 = arith.constant 0 : index
    %c0_5 = arith.constant 0 : index
    %5 = vector.load %arg3[%c0_4, %c0_5] : memref<128x32xbf16, #tpu.memory_space<vmem>>, vector<128x32xbf16>
    %cst = arith.constant dense<0.000000e+00> : vector<16x32xf32>
    %6 = tpu.matmul %4, %5, %cst {dimension_numbers = #tpu.dot_dimension_numbers<[1], [0], [0], [1], [0, 0, 1, 1], [], []>} : vector<16x128xbf16>, vector<128x32xbf16>, vector<16x32xf32> -> vector<16x32xf32>
    %7 = arith.addf %3, %6 : vector<16x32xf32>
    %c0_6 = arith.constant 0 : index
    %c0_7 = arith.constant 0 : index
    %8 = vector.load %arg9[%c0_6, %c0_7] : memref<16x32xf32, #tpu.memory_space<vmem>>, vector<16x32xf32>
    tpu.vector_store %arg9[%c0_6, %c0_7], %7 {strides = array<i32>} : memref<16x32xf32, #tpu.memory_space<vmem>>, vector<16x32xf32>,
    %c0_i32_8 = arith.constant 0 : i32
    %9 = arith.cmpi eq, %arg1, %c0_i32_8 : i32
    %10 = arith.extui %9 : i1 to i32
    %c0_i32_9 = arith.constant 0 : i32
    %11 = arith.cmpi ne, %10, %c0_i32_9 : i32
    scf.if %11 {
      %c0_10 = arith.constant 0 : index
      %c0_11 = arith.constant 0 : index
      %12 = vector.load %arg9[%c0_10, %c0_11] : memref<16x32xf32, #tpu.memory_space<vmem>>, vector<16x32xf32>
      %c0_12 = arith.constant 0 : index
      %c0_13 = arith.constant 0 : index
      %13 = vector.load %arg4[%c0_12, %c0_13] : memref<1x32xf32, #tpu.memory_space<vmem>>, vector<1x32xf32>
      %14 = vector.broadcast %13 : vector<1x32xf32> to vector<16x32xf32>
      %15 = arith.addf %12, %14 : vector<16x32xf32>
      %c0_14 = arith.constant 0 : index
      %c0_15 = arith.constant 0 : index
      %16 = vector.load %arg5[%c0_14, %c0_15] : memref<16x32xbf16, #tpu.memory_space<vmem>>, vector<16x32xbf16>
      %17 = arith.extf %16 : vector<16x32xbf16> to vector<16x32xf32>
      %18 = arith.addf %15, %17 : vector<16x32xf32>
      %cst_16 = arith.constant dense<0.000000e+00> : vector<16xf32>
      %19 = vector.multi_reduction <add>, %18, %cst_16 [1] : vector<16x32xf32> to vector<16xf32>
      %20 = vector.shape_cast %19 : vector<16xf32> to vector<16x1xf32>
      %cst_17 = arith.constant 3.200000e+01 : f32
      %21 = vector.broadcast %cst_17 : f32 to vector<16x1xf32>
      %22 = arith.divf %20, %21 : vector<16x1xf32>
      %23 = vector.broadcast %22 : vector<16x1xf32> to vector<16x32xf32>
      %24 = arith.subf %18, %23 : vector<16x32xf32>
      %25 = arith.mulf %24, %24 : vector<16x32xf32>
      %cst_18 = arith.constant dense<0.000000e+00> : vector<16xf32>
      %26 = vector.multi_reduction <add>, %25, %cst_18 [1] : vector<16x32xf32> to vector<16xf32>
      %27 = vector.shape_cast %26 : vector<16xf32> to vector<16x1xf32>
      %cst_19 = arith.constant 3.200000e+01 : f32
      %28 = vector.broadcast %cst_19 : f32 to vector<16x1xf32>
      %29 = arith.divf %27, %28 : vector<16x1xf32>
      %cst_20 = arith.constant 9.99999996E-13 : f32
      %30 = vector.broadcast %cst_20 : f32 to vector<16x1xf32>
      %31 = arith.addf %29, %30 : vector<16x1xf32>
      %32 = math.rsqrt %31 : vector<16x1xf32>
      %33 = vector.broadcast %32 : vector<16x1xf32> to vector<16x32xf32>
      %34 = arith.mulf %24, %33 : vector<16x32xf32>
      %c0_21 = arith.constant 0 : index
      %c0_22 = arith.constant 0 : index
      %35 = vector.load %arg6[%c0_21, %c0_22] : memref<1x32xf32, #tpu.memory_space<vmem>>, vector<1x32xf32>
      %36 = vector.broadcast %35 : vector<1x32xf32> to vector<16x32xf32>
      %37 = arith.mulf %34, %36 : vector<16x32xf32>
      %c0_23 = arith.constant 0 : index
      %c0_24 = arith.constant 0 : index
      %38 = vector.load %arg7[%c0_23, %c0_24] : memref<1x32xf32, #tpu.memory_space<vmem>>, vector<1x32xf32>
      %39 = vector.broadcast %38 : vector<1x32xf32> to vector<16x32xf32>
      %40 = arith.addf %37, %39 : vector<16x32xf32>
      %41 = arith.truncf %40 : vector<16x32xf32> to vector<16x32xbf16>
      %c0_25 = arith.constant 0 : index
      %c0_26 = arith.constant 0 : index
      %42 = vector.load %arg8[%c0_25, %c0_26] : memref<16x32xbf16, #tpu.memory_space<vmem>>, vector<16x32xbf16>
      tpu.vector_store %arg8[%c0_25, %c0_26], %41 {strides = array<i32>} : memref<16x32xbf16, #tpu.memory_space<vmem>>, vector<16x32xbf16>,
    } else {
    }
    return
  }
  func.func @transform_0(%arg0: i32, %arg1: i32) -> (i32, i32) {
    %c0_i32 = arith.constant 0 : i32
    return %arg0, %arg1 : i32, i32
  }
  func.func @transform_1(%arg0: i32, %arg1: i32) -> (i32, i32) {
    %c0_i32 = arith.constant 0 : i32
    %c0_i32_0 = arith.constant 0 : i32
    return %arg1, %c0_i32 : i32, i32
  }
  func.func @transform_2(%arg0: i32, %arg1: i32) -> (i32, i32) {
    %c0_i32 = arith.constant 0 : i32
    %c0_i32_0 = arith.constant 0 : i32
    %c0_i32_1 = arith.constant 0 : i32
    return %c0_i32, %c0_i32_0 : i32, i32
  }
  func.func @transform_3(%arg0: i32, %arg1: i32) -> (i32, i32) {
    %c0_i32 = arith.constant 0 : i32
    %c0_i32_0 = arith.constant 0 : i32
    return %arg0, %c0_i32 : i32, i32
  }
  func.func @transform_4(%arg0: i32, %arg1: i32) -> (i32, i32) {
    %c0_i32 = arith.constant 0 : i32
    %c0_i32_0 = arith.constant 0 : i32
    %c0_i32_1 = arith.constant 0 : i32
    return %c0_i32, %c0_i32_0 : i32, i32
  }
  func.func @transform_5(%arg0: i32, %arg1: i32) -> (i32, i32) {
    %c0_i32 = arith.constant 0 : i32
    %c0_i32_0 = arith.constant 0 : i32
    %c0_i32_1 = arith.constant 0 : i32
    return %c0_i32, %c0_i32_0 : i32, i32
  }
  func.func @transform_6(%arg0: i32, %arg1: i32) -> (i32, i32) {
    %c0_i32 = arith.constant 0 : i32
    %c0_i32_0 = arith.constant 0 : i32
    return %arg0, %c0_i32 : i32, i32
  }
}

</mosaic_0001>

<bundles_post_ra>
// kernel: bert_forward.12
= control target key start
LH: loop header
LB: loop body
LE: loop exit
PB: predicated region body
PF: predicated region fallthrough
CT: control target
= control target key end

     0   :  { %8 = vsyncpa [#allocation4], 0  ;;  %s418_s0 = inlined_call_operand.hbm [shape: bf16[16,32], index: 0, kind: input, shape index: {}]   ;;  %s419_s1 = inlined_call_operand.hbm [shape: bf16[32,128], index: 1, kind: input, shape index: {}]   ;;  %s420_s2 = inlined_call_operand.hbm [shape: f32[1,128], index: 2, kind: input, shape index: {}]   ;;  %s421_s3 = inlined_call_operand.hbm [shape: bf16[16,128], index: 3, kind: output, shape index: {}]  }
   0x1   :  { %9 = vsyncpa [#allocation7], 0 }
   0x2   :  { %10 = vsyncpa [#allocation5], 0  ;;  %s326_s12 = smov [#allocation6]   ;;  %s327_s14 = smov [#allocation3]  }
   0x3   :  { %s28_s13 = sshll.u32 %s326_s12, 4  ;;  %s16_s15 = sshll.u32 %s327_s14, 4  ;;  %s29_s13 = int_to_ptr.vmem [resolvable:$true] %s28_s13  ;;  %s354_s15 = int_to_ptr.vmem [resolvable:$true] %s16_s15 }
   0x4   :  { %s232_s18 = scalar_lea.hbm %s419_s1, 256 }
   0x5   :  { %p233_p0 = scmp.ne.s32.totalorder %s419_s1, %s232_s18  ;;  %p236_p1 = scmp.lt.u32.totalorder %s232_s18, %s419_s1 }
   0x7   :  { %p238_p2 = pnand %p236_p1, %p233_p0 }
   0x9   :  { %241 = shalt.err (!%p238_p2)
}
   0xa   :  { %s242_s23 = scalar_lea.vmem %s29_s13, 256  ;;  %p247_p4 = scmp.lt.s32.totalorder %s29_s13, %s29_s13 }
   0xb   :  { %p243_p3 = scmp.ne.s32.totalorder %s29_s13, %s242_s23  ;;  %p248_p5 = scmp.lt.s32.totalorder %s242_s23, %s242_s23 }
   0xd   :  { %p249_p6 = por %p248_p5, %p247_p4 }
   0xf   :  { %p250_p7 = pnand %p249_p6, %p243_p3 }
  0x11   :  { %253 = shalt.err (!%p250_p7)
}
  0x12   :  { %s328_s24 = smov 64   ;;  %s329_s25 = smov 4  }
  0x13   :  { %34 = dma.hbm_to_vmem [thread:$0]  %s419_s1, 256, %s29_s13, [#allocation7], %s328_s24, %s328_s24, %s329_s25  }
  0x14   :  { %s254_s30 = scalar_lea.hbm %s418_s0, 128 }
  0x15   :  { %p255_p8 = scmp.ne.s32.totalorder %s418_s0, %s254_s30  ;;  %p258_p9 = scmp.lt.u32.totalorder %s254_s30, %s418_s0 }
  0x17   :  { %p260_p10 = pnand %p258_p9, %p255_p8 }
  0x19   :  { %263 = shalt.err (!%p260_p10)
}
  0x1a   :  { %s264_s8 = scalar_lea.vmem %s354_s15, 128  ;;  %p269_p12 = scmp.lt.s32.totalorder %s354_s15, %s354_s15 }
  0x1b   :  { %p265_p11 = scmp.ne.s32.totalorder %s354_s15, %s264_s8  ;;  %p270_p13 = scmp.lt.s32.totalorder %s264_s8, %s264_s8 }
  0x1d   :  { %p271_p0 = por %p270_p13, %p269_p12 }
  0x1f   :  { %p272_p1 = pnand %p271_p0, %p265_p11 }
  0x21   :  { %275 = shalt.err (!%p272_p1)
}
  0x22   :  { %22 = dma.hbm_to_vmem [thread:$0]  %s418_s0, 128, %s354_s15, [#allocation4], %s328_s24, %s328_s24, %s329_s25  }
  0x23   :  { %s330_s10 = smov [#allocation8]   ;;  %s276_s14 = scalar_lea.hbm %s420_s2, 16 }
  0x24   :  { %s41_s11 = sshll.u32 %s330_s10, 4  ;;  %p277_p2 = scmp.ne.s32.totalorder %s420_s2, %s276_s14  ;;  %s42_s11 = int_to_ptr.vmem [resolvable:$true] %s41_s11 }
  0x25   :  { %p280_p3 = scmp.lt.u32.totalorder %s276_s14, %s420_s2 }
  0x27   :  { %p282_p4 = pnand %p280_p3, %p277_p2 }
  0x29   :  { %285 = shalt.err (!%p282_p4)
}
  0x2a   :  { %s286_s20 = scalar_lea.vmem %s42_s11, 16  ;;  %s290_s0 = scalar_lea.vmem %s42_s11, 32 }
  0x2b   :  { %p287_p5 = scmp.ne.s32.totalorder %s42_s11, %s286_s20  ;;  %p291_p6 = scmp.lt.s32.totalorder %s42_s11, %s42_s11 }
  0x2c   :  { %p292_p7 = scmp.lt.s32.totalorder %s290_s0, %s286_s20 }
  0x2e   :  { %p293_p8 = por %p292_p7, %p291_p6 }
  0x30   :  { %p294_p9 = pnand %p293_p8, %p287_p5 }
  0x32   :  { %297 = shalt.err (!%p294_p9)
}
  0x33   :  { %44 = dma.hbm_to_vmem [thread:$0]  %s420_s2, 16, %s42_s11, [#allocation7]  }
  0x34   :  { %320 = dma.done.wait [#allocation4], 128  }
  0x35   :  { %321 = vsyncadd [#allocation4], 4294967168 }
  0x36   :  { %322 = dma.done.wait [#allocation7], 272  }
  0x37   :  { %323 = vsyncadd [#allocation7], 4294967024  ;;  %v331_v0 = vmov 0.0   ;;  %vm332_vm0 = vmmov 0   ;;  %v227_v1 = vld [vmem:[#allocation6] sm:$0xff]   ;;  %v228_v2 = vld [vmem:[#allocation6 + $0x8] sm:$0xff]  }
  0x38   :  { %211 = vmatprep.subr.bf16.mxu0 %v331_v0  ;;  %215 = vmatprep.mubr.msk.bf16.mxu0 %vm332_vm0, %v331_v0  ;;  %v229_v3 = vld [vmem:[#allocation3] sm:$0xff]   ;;  %vm88_vm1 = vcmask 261120   ;;  %v198_v5 = vld [vmem:[#allocation8] ss:$0 sm:$0xff]  ;;  %s333_s2 = smov [#allocation9]  }
  0x39   :  { %212 = vmatpush3.bf16.msra.mxu0 %v227_v1  ;;  %s181_s22 = sshll.u32 %s333_s2, 4  ;;  %s182_s22 = int_to_ptr.vmem [resolvable:$true] %s181_s22 }
  0x3a   :  { %213 = vmatprep.subr.bf16.mxu0 %v331_v0  ;;  %s298_s23 = scalar_lea.vmem %s182_s22, 128  ;;  %p303_p11 = scmp.lt.s32.totalorder %s182_s22, %s182_s22 }
  0x3b   :  { %p299_p10 = scmp.ne.s32.totalorder %s182_s22, %s298_s23  ;;  %p304_p12 = scmp.lt.s32.totalorder %s298_s23, %s298_s23 }
  0x3d   :  { %214 = vmatpush3.bf16.msra.mxu0 %v228_v2  ;;  %p305_p13 = por %p304_p12, %p303_p11 }
  0x3f   :  { %p306_p0 = pnand %p305_p13, %p299_p10 }
  0x40   :  { %216 = vmatmul.mubr.msk.bf16.vlgmr.msra.gmra.mrb[0].mxu0 %vm88_vm1, %v229_v3 }
 0x113   :  { %v126_v4 = vpop.f32.mrb[0].mxu0 }
 0x114   :  { %v217_v6 = vpop.f32.mrb[1].mxu0  ;;  %v149_v8 = vadd.f32 %v198_v5, %v126_v4 }
 0x115   :  { %v129_v7 = vpop.f32.mrb[2].mxu0 }
 0x116   :  { %v150_v9 = vadd.f32 %v198_v5, %v129_v7  ;;  %v218_v10 = vpop.f32.mrb[3].mxu0  ;;  %v158_v20 = vmul.f32 0.5, %v149_v8 }
 0x118   :  { %v151_v11 = vpack.c.bf16 %v150_v9, %v149_v8  ;;  %v159_v21 = vmul.f32 0.5, %v150_v9 }
 0x11a   :  { %v152_v12 = vmul.bf16 %v151_v11, %v151_v11 }
 0x11c   :  { %v153_v13 = vmul.bf16 %v152_v12, %v151_v11 }
 0x11e   :  { %v154_v14 = vmul.bf16 1027030327, %v153_v13 }
 0x120   :  { %v155_v15 = vadd.bf16 %v154_v14, %v151_v11 }
 0x122   :  { %v156_v16 = vmul.bf16 1061961548, %v155_v15 }
 0x124   :  { %230 = vtanh.bf16 %v156_v16 }
 0x12f   :  { %v231_v17 = vpop.eup %230 }
 0x130   :  { %v161_v18 = vunpack.c.h.bf16 %v231_v17  ;;  %v160_v19 = vunpack.c.l.bf16 %v231_v17 }
 0x132   :  { %v163_v22 = vadd.f32 1.0, %v161_v18  ;;  %v162_v23 = vadd.f32 1.0, %v160_v19 }
 0x134   :  { %v165_v24 = vmul.f32 %v163_v22, %v159_v21  ;;  %v164_v25 = vmul.f32 %v162_v23, %v158_v20 }
 0x136   :  { %v206_v26 = vpack.c.bf16 %v165_v24, %v164_v25 }
 0x138   :  { %207 = vst [vmem:[#allocation9] sm:$0xff] %v206_v26  }
 0x139   :  { %309 = shalt.err (!%p306_p0)
}
 0x13a   :  { %s310_s28 = scalar_lea.hbm %s421_s3, 128 }
 0x13b   :  { %p311_p1 = scmp.ne.s32.totalorder %s421_s3, %s310_s28  ;;  %p314_p2 = scmp.lt.u32.totalorder %s310_s28, %s421_s3 }
 0x13d   :  { %p316_p3 = pnand %p314_p2, %p311_p1 }
 0x13f   :  { %319 = shalt.err (!%p316_p3)
}
 0x140   :  { %187 = dma.vmem_to_hbm [thread:$0]  %s182_s22, 128, %s421_s3, [#allocation5], %s328_s24, %s328_s24, %s329_s25  }
 0x141   :  { %324 = dma.done.wait [#allocation5], 128  }
 0x142   :  { %325 = vsyncadd [#allocation5], 4294967168 }
 0x143   :  { %191 = vsyncpa [#allocation4], 1 }
 0x144   :  { %192 = vsyncpa [#allocation7], 1 }
 0x145   :  { %193 = vsyncpa [#allocation5], 1 }

// kernel: bert_forward.10
= control target key start
LH: loop header
LB: loop body
LE: loop exit
PB: predicated region body
PF: predicated region fallthrough
CT: control target
= control target key end

     0   :  { %8 = vsyncpa [#allocation4], 0  ;;  %s401_s0 = inlined_call_operand.hbm [shape: bf16[16,32], index: 0, kind: input, shape index: {}]   ;;  %s402_s1 = inlined_call_operand.hbm [shape: bf16[32,96], index: 1, kind: input, shape index: {}]   ;;  %s403_s2 = inlined_call_operand.hbm [shape: f32[1,96], index: 2, kind: input, shape index: {}]   ;;  %s404_s3 = inlined_call_operand.hbm [shape: bf16[16,96], index: 3, kind: output, shape index: {}]  }
   0x1   :  { %9 = vsyncpa [#allocation7], 0 }
   0x2   :  { %10 = vsyncpa [#allocation5], 0  ;;  %s305_s12 = smov [#allocation6]   ;;  %s306_s14 = smov [#allocation3]  }
   0x3   :  { %s28_s13 = sshll.u32 %s305_s12, 4  ;;  %s16_s15 = sshll.u32 %s306_s14, 4  ;;  %s29_s13 = int_to_ptr.vmem [resolvable:$true] %s28_s13  ;;  %s333_s15 = int_to_ptr.vmem [resolvable:$true] %s16_s15 }
   0x4   :  { %s211_s18 = scalar_lea.hbm %s402_s1, 256 }
   0x5   :  { %p212_p0 = scmp.ne.s32.totalorder %s402_s1, %s211_s18  ;;  %p215_p1 = scmp.lt.u32.totalorder %s211_s18, %s402_s1 }
   0x7   :  { %p217_p2 = pnand %p215_p1, %p212_p0 }
   0x9   :  { %220 = shalt.err (!%p217_p2)
}
   0xa   :  { %s221_s23 = scalar_lea.vmem %s29_s13, 256  ;;  %p226_p4 = scmp.lt.s32.totalorder %s29_s13, %s29_s13 }
   0xb   :  { %p222_p3 = scmp.ne.s32.totalorder %s29_s13, %s221_s23  ;;  %p227_p5 = scmp.lt.s32.totalorder %s221_s23, %s221_s23 }
   0xd   :  { %p228_p6 = por %p227_p5, %p226_p4 }
   0xf   :  { %p229_p7 = pnand %p228_p6, %p222_p3 }
  0x11   :  { %232 = shalt.err (!%p229_p7)
}
  0x12   :  { %s307_s24 = smov 64   ;;  %s308_s25 = smov 4  }
  0x13   :  { %34 = dma.hbm_to_vmem [thread:$0]  %s402_s1, 256, %s29_s13, [#allocation7], %s307_s24, %s307_s24, %s308_s25  }
  0x14   :  { %s233_s30 = scalar_lea.hbm %s401_s0, 128 }
  0x15   :  { %p234_p8 = scmp.ne.s32.totalorder %s401_s0, %s233_s30  ;;  %p237_p9 = scmp.lt.u32.totalorder %s233_s30, %s401_s0 }
  0x17   :  { %p239_p10 = pnand %p237_p9, %p234_p8 }
  0x19   :  { %242 = shalt.err (!%p239_p10)
}
  0x1a   :  { %s243_s8 = scalar_lea.vmem %s333_s15, 128  ;;  %p248_p12 = scmp.lt.s32.totalorder %s333_s15, %s333_s15 }
  0x1b   :  { %p244_p11 = scmp.ne.s32.totalorder %s333_s15, %s243_s8  ;;  %p249_p13 = scmp.lt.s32.totalorder %s243_s8, %s243_s8 }
  0x1d   :  { %p250_p0 = por %p249_p13, %p248_p12 }
  0x1f   :  { %p251_p1 = pnand %p250_p0, %p244_p11 }
  0x21   :  { %254 = shalt.err (!%p251_p1)
}
  0x22   :  { %22 = dma.hbm_to_vmem [thread:$0]  %s401_s0, 128, %s333_s15, [#allocation4], %s307_s24, %s307_s24, %s308_s25  }
  0x23   :  { %s309_s10 = smov [#allocation8]   ;;  %s255_s14 = scalar_lea.hbm %s403_s2, 16 }
  0x24   :  { %s41_s11 = sshll.u32 %s309_s10, 4  ;;  %p256_p2 = scmp.ne.s32.totalorder %s403_s2, %s255_s14  ;;  %s42_s11 = int_to_ptr.vmem [resolvable:$true] %s41_s11 }
  0x25   :  { %p259_p3 = scmp.lt.u32.totalorder %s255_s14, %s403_s2 }
  0x27   :  { %p261_p4 = pnand %p259_p3, %p256_p2 }
  0x29   :  { %264 = shalt.err (!%p261_p4)
}
  0x2a   :  { %s265_s20 = scalar_lea.vmem %s42_s11, 16  ;;  %s269_s0 = scalar_lea.vmem %s42_s11, 32 }
  0x2b   :  { %p266_p5 = scmp.ne.s32.totalorder %s42_s11, %s265_s20  ;;  %p270_p6 = scmp.lt.s32.totalorder %s42_s11, %s42_s11 }
  0x2c   :  { %p271_p7 = scmp.lt.s32.totalorder %s269_s0, %s265_s20 }
  0x2e   :  { %p272_p8 = por %p271_p7, %p270_p6 }
  0x30   :  { %p273_p9 = pnand %p272_p8, %p266_p5 }
  0x32   :  { %276 = shalt.err (!%p273_p9)
}
  0x33   :  { %44 = dma.hbm_to_vmem [thread:$0]  %s403_s2, 16, %s42_s11, [#allocation7]  }
  0x34   :  { %299 = dma.done.wait [#allocation4], 128  }
  0x35   :  { %300 = vsyncadd [#allocation4], 4294967168 }
  0x36   :  { %301 = dma.done.wait [#allocation7], 272  }
  0x37   :  { %302 = vsyncadd [#allocation7], 4294967024  ;;  %vm59_vm0 = vcmask 785408   ;;  %v310_v0 = vmov 0.0   ;;  %vm311_vm1 = vmmov 0   ;;  %v208_v1 = vld [vmem:[#allocation6] sm:$0xff]  }
  0x38   :  { %60 = vst.msk [vmem:[#allocation2] sm:$0xff] %vm59_vm0, %v310_v0  ;;  %61 = vst.msk [vmem:[#allocation2 + $0x8] sm:$0xff] %vm59_vm0, %v310_v0  ;;  %192 = vmatprep.subr.bf16.mxu0 %v310_v0  ;;  %196 = vmatprep.mubr.msk.bf16.mxu0 %vm311_vm1, %v310_v0  ;;  %v209_v2 = vld [vmem:[#allocation6 + $0x8] sm:$0xff]   ;;  %v210_v3 = vld [vmem:[#allocation3] sm:$0xff]   ;;  %vm87_vm2 = vcmask 261120   ;;  %vm159_vm3 = vcmask 781312  }
  0x39   :  { %193 = vmatpush3.bf16.msra.mxu0 %v208_v1  ;;  %v184_v12 = vld [vmem:[#allocation8] ss:$0 sm:$0xff]  ;;  %s312_s2 = smov [#allocation9]  }
  0x3a   :  { %194 = vmatprep.subr.bf16.mxu0 %v310_v0  ;;  %s167_s22 = sshll.u32 %s312_s2, 4  ;;  %s168_s22 = int_to_ptr.vmem [resolvable:$true] %s167_s22 }
  0x3b   :  { %s277_s23 = scalar_lea.vmem %s168_s22, 128  ;;  %p282_p11 = scmp.lt.s32.totalorder %s168_s22, %s168_s22 }
  0x3c   :  { %p278_p10 = scmp.ne.s32.totalorder %s168_s22, %s277_s23  ;;  %p283_p12 = scmp.lt.s32.totalorder %s277_s23, %s277_s23 }
  0x3d   :  { %195 = vmatpush3.bf16.msra.mxu0 %v209_v2 }
  0x3e   :  { %p284_p13 = por %p283_p12, %p282_p11 }
  0x3f   :  { %v62_v4 = vld [vmem:[#allocation2] sm:$0xff]  ;;  %v63_v6 = vld [vmem:[#allocation2 + $0x8] sm:$0xff] }
  0x40   :  { %197 = vmatmul.mubr.msk.bf16.vlgmr.msra.gmra.mrb[0].mxu0 %vm87_vm2, %v210_v3  ;;  %p285_p0 = pnand %p284_p13, %p278_p10 }
 0x113   :  { %v125_v5 = vpop.f32.mrb[0].mxu0 }
 0x114   :  { %v132_v7 = vadd.f32 %v125_v5, %v62_v4  ;;  %v198_v8 = vpop.f32.mrb[1].mxu0 }
 0x115   :  { %v128_v9 = vpop.f32.mrb[2].mxu0 }
 0x116   :  { %135 = vst.msk [vmem:[#allocation2] sm:$0xff] %vm59_vm0, %v132_v7  ;;  %v133_v10 = vadd.f32 %v128_v9, %v63_v6  ;;  %v199_v11 = vpop.f32.mrb[3].mxu0 }
 0x118   :  { %136 = vst.msk [vmem:[#allocation2 + $0x8] sm:$0xff] %vm59_vm0, %v133_v10 }
 0x11d   :  { %v140_v13 = vld [vmem:[#allocation2] sm:$0xff] }
 0x11e   :  { %v149_v14 = vadd.f32 %v184_v12, %v140_v13 }
 0x11f   :  { %v141_v15 = vld [vmem:[#allocation2 + $0x8] sm:$0xff] }
 0x120   :  { %v150_v16 = vadd.f32 %v184_v12, %v141_v15  ;;  %v187_v17 = vpack.c.bf16 %v149_v14, %v149_v14 }
 0x122   :  { %v188_v18 = vpack.c.bf16 %v150_v16, %v150_v16  ;;  %160 = vst.msk [vmem:[#allocation9] sm:$0xf] %vm159_vm3, %v187_v17 }
 0x124   :  { %161 = vst.msk [vmem:[#allocation9 + $0x4] sm:$0xf] %vm159_vm3, %v188_v18 }
 0x125   :  { %288 = shalt.err (!%p285_p0)
}
 0x126   :  { %s289_s28 = scalar_lea.hbm %s404_s3, 128 }
 0x127   :  { %p290_p1 = scmp.ne.s32.totalorder %s404_s3, %s289_s28  ;;  %p293_p2 = scmp.lt.u32.totalorder %s289_s28, %s404_s3 }
 0x129   :  { %p295_p3 = pnand %p293_p2, %p290_p1 }
 0x12b   :  { %298 = shalt.err (!%p295_p3)
}
 0x12c   :  { %173 = dma.vmem_to_hbm [thread:$0]  %s168_s22, 128, %s404_s3, [#allocation5], %s307_s24, %s307_s24, %s308_s25  }
 0x12d   :  { %303 = dma.done.wait [#allocation5], 128  }
 0x12e   :  { %304 = vsyncadd [#allocation5], 4294967168 }
 0x12f   :  { %177 = vsyncpa [#allocation4], 1 }
 0x130   :  { %178 = vsyncpa [#allocation7], 1 }
 0x131   :  { %179 = vsyncpa [#allocation5], 1 }

// kernel: bert_forward.9
= control target key start
LH: loop header
LB: loop body
LE: loop exit
PB: predicated region body
PF: predicated region fallthrough
CT: control target
= control target key end

     0   :  { %9 = vsyncpa [#allocation3], 0  ;;  %s978_s0 = inlined_call_operand.hbm [shape: bf16[16,32], index: 0, kind: input, shape index: {}]   ;;  %s979_s1 = inlined_call_operand.hbm [shape: f32[8,32], index: 1, kind: input, shape index: {}]   ;;  %s980_s2 = inlined_call_operand.hbm [shape: f32[1,32], index: 2, kind: input, shape index: {}]   ;;  %s981_s3 = inlined_call_operand.hbm [shape: f32[1,32], index: 3, kind: input, shape index: {}]   ;;  %s982_s4 = inlined_call_operand.hbm [shape: bf16[16,32], index: 4, kind: output, shape index: {}]  }
   0x1   :  { %11 = vsyncpa [#allocation3 + $0x1], 0 }
   0x2   :  { %12 = vsyncpa [#allocation6], 0 }
   0x3   :  { %13 = vsyncpa [#allocation9], 0 }
   0x4   :  { %14 = vsyncpa [#allocation4], 0 }
   0x5   :  { %16 = vsyncpa [#allocation4 + $0x1], 0  ;;  %s721_s15 = smov 0   ;;  %s723_s16 = smov 0  }
   0x6   :  { %s725_s17 = smov 0   ;;  %s727_s18 = smov 0  }
   0x7 LB: > { %s742_s19 = sadd.s32 4294967295, %s689_s18   ;;  %s402_s20 = sadd.s32 4294967294, %s689_s18   ;;  %s689_s18 = sphi %s727_s18, %s1005_s18   ;;  %s685_s17 = sphi %s725_s17, %s1004_s17   ;;  %s681_s16 = sphi %s723_s16, %s1003_s16   ;;  %s677_s15 = sphi %s721_s15, %s1002_s15  }
   0x8   : > { %p42_p0 = scmp.ne.s32.totalorder %s681_s16, %s677_s15  ;;  %p983_p1 = scmp.eq.s32.totalorder %s742_s19, 0 }
   0x9   : > { %p135_p3 = scmp.eq.s32.totalorder %s402_s20, 1  ;;  %p403_p5 = scmp.ge.s32.totalorder %s689_s18, 1 }
   0xa   : > { %p751_p4 = por %p983_p1, %p42_p0  ;;  %p142_p7 = scmp.lt.s32.totalorder %s689_s18, 3 }
   0xb   : > { %p756_p6 = por %p135_p3, %p42_p0  ;;  %s691_s24 = smov [#allocation5]  }
   0xc   : > { %s986_s21 = scalar_select %p751_p4, 1, 0 }
   0xd   : > { %s987_s22 = scalar_select %p756_p6, 1, 0 }
   0xe   : > { %p761_p8 = pnand %p403_p5, %p142_p7  ;;  %s155_s25 = sshll.u32 %s691_s24, 4  ;;  %s156_s25 = int_to_ptr.vmem [resolvable:$true] %s155_s25 }
   0xf   : > { %s692_s26 = smov [#allocation7]   ;;  %s693_s29 = smov [#allocation8]  }
  0x10   : > { %s988_s23 = scalar_select %p761_p8, 1, 0 }
  0x11   : > { %p438_p10 = pneg %p761_p8  ;;  %s166_s27 = sshll.u32 %s692_s26, 4  ;;  %s774_s27 = int_to_ptr.vmem [resolvable:$true] %s166_s27 }
  0x12   : > { %s177_s30 = sshll.u32 %s693_s29, 4  ;;  %s501_s7 = scalar_lea.hbm %s979_s1, 128  ;;  %s776_s30 = int_to_ptr.vmem [resolvable:$true] %s177_s30 }
  0x13   : > { %p770_p11 = pnand %p438_p10, %p983_p1  ;;  %p502_p12 = scmp.ne.s32.totalorder %s979_s1, %s501_s7 }
  0x14   : > { %p508_p5 = scmp.lt.u32.totalorder %s501_s7, %s979_s1 }
  0x15   : > { %p786_p13 = pneg %p770_p11 }
  0x17   : > { %p504_p0 = pnand %p786_p13, %p502_p12 }
  0x19   : > { %p505_p3 = pneg %p504_p0 }
  0x1b   : > { %p510_p7 = pnand %p508_p5, %p505_p3 }
  0x1d   : > { %513 = shalt.err (!%p510_p7)
}
  0x1e   : > { %s514_s13 = scalar_lea.vmem %s156_s25, 128  ;;  %p522_p2 = scmp.lt.s32.totalorder %s156_s25, %s156_s25 }
  0x1f   : > { %p515_p10 = scmp.ne.s32.totalorder %s156_s25, %s514_s13  ;;  %p523_p6 = scmp.lt.s32.totalorder %s514_s13, %s514_s13 }
  0x21   : > { %p517_p9 = pnand %p515_p10, %p786_p13  ;;  %p524_p4 = por %p523_p6, %p522_p2 }
  0x23   : > { %p518_p1 = pneg %p517_p9 }
  0x25   : > { %p525_p8 = pnand %p524_p4, %p518_p1 }
  0x27   : > { %528 = shalt.err (!%p525_p8)
}
  0x28   : > { %441 = dma.hbm_to_vmem [thread:$0]  (!%p770_p11), %s979_s1, 128, %s156_s25, [#allocation6]  }
  0x29   : > { %s529_s29 = scalar_lea.hbm %s980_s2, 16 }
  0x2a   : > { %p530_p9 = scmp.ne.s32.totalorder %s980_s2, %s529_s29  ;;  %p536_p1 = scmp.lt.u32.totalorder %s529_s29, %s980_s2 }
  0x2c   : > { %p532_p12 = pnand %p530_p9, %p786_p13 }
  0x2e   : > { %p533_p2 = pneg %p532_p12 }
  0x30   : > { %p538_p4 = pnand %p536_p1, %p533_p2 }
  0x32   : > { %541 = shalt.err (!%p538_p4)
}
  0x33   : > { %s542_s25 = scalar_lea.vmem %s774_s27, 16  ;;  %s549_s9 = scalar_lea.vmem %s774_s27, 32 }
  0x34   : > { %p543_p6 = scmp.ne.s32.totalorder %s774_s27, %s542_s25  ;;  %p550_p3 = scmp.lt.s32.totalorder %s774_s27, %s774_s27 }
  0x35   : > { %p551_p5 = scmp.lt.s32.totalorder %s549_s9, %s542_s25 }
  0x36   : > { %p545_p8 = pnand %p543_p6, %p786_p13 }
  0x37   : > { %p552_p7 = por %p551_p5, %p550_p3 }
  0x38   : > { %p546_p0 = pneg %p545_p8 }
  0x3a   : > { %p553_p10 = pnand %p552_p7, %p546_p0 }
  0x3c   : > { %556 = shalt.err (!%p553_p10)
}
  0x3d   : > { %444 = dma.hbm_to_vmem [thread:$0]  (!%p770_p11), %s980_s2, 16, %s774_s27, [#allocation6]  }
  0x3e   : > { %s557_s20 = scalar_lea.hbm %s981_s3, 16 }
  0x3f   : > { %p558_p9 = scmp.ne.s32.totalorder %s981_s3, %s557_s20  ;;  %p564_p1 = scmp.lt.u32.totalorder %s557_s20, %s981_s3 }
  0x41   : > { %p560_p12 = pnand %p558_p9, %p786_p13 }
  0x43   : > { %p561_p2 = pneg %p560_p12 }
  0x45   : > { %p566_p4 = pnand %p564_p1, %p561_p2 }
  0x47   : > { %569 = shalt.err (!%p566_p4)
}
  0x48   : > { %s570_s27 = scalar_lea.vmem %s776_s30, 16  ;;  %s577_s6 = scalar_lea.vmem %s776_s30, 32 }
  0x49   : > { %p571_p6 = scmp.ne.s32.totalorder %s776_s30, %s570_s27  ;;  %p578_p3 = scmp.lt.s32.totalorder %s776_s30, %s776_s30 }
  0x4a   : > { %p579_p5 = scmp.lt.s32.totalorder %s577_s6, %s570_s27 }
  0x4b   : > { %p573_p8 = pnand %p571_p6, %p786_p13 }
  0x4c   : > { %p580_p7 = por %p579_p5, %p578_p3 }
  0x4d   : > { %p574_p0 = pneg %p573_p8 }
  0x4f   : > { %p581_p10 = pnand %p580_p7, %p574_p0 }
  0x51   : > { %584 = shalt.err (!%p581_p10)
}
  0x52   : > { %447 = dma.hbm_to_vmem [thread:$0]  (!%p770_p11), %s981_s3, 16, %s776_s30, [#allocation9]  }
  0x53   : > { %s851_s10 = sadd.s32 1, %s689_s18   ;;  %s29_s25 = sadd.s32 1, %s685_s17 }
  0x54   : > { %s26_s28 = ssub.s32 %s689_s18, %s851_s10  ;;  %p36_p9 = scmp.ne.s32.totalorder %s685_s17, %s681_s16 }
  0x55   : > { %p27_p13 = scmp.eq.s32.totalorder %s26_s28, 0  ;;  %p37_p12 = scmp.eq.s32.totalorder %s689_s18, 0 }
  0x56   : > { %p459_p2 = scmp.lt.s32.totalorder %s689_s18, 2  ;;  %p991_p4 = scmp.eq.s32.totalorder %s742_s19, 1 }
  0x57   : > { %s861_s9 = scalar_select %p27_p13, %s685_s17, %s29_s25  }
  0x58   : > { %p38_p1 = por %p37_p12, %p36_p9  ;;  %p865_p6 = por %p991_p4, %p36_p9 }
  0x59   : > { %s188_s12 = sand.u32 1, %s685_s17   ;;  %s409_s13 = sshll.u32 %s689_s18, 6 }
  0x5a   : > { %s408_s30 = sshll.u32 %s188_s12, 2  ;;  %s874_s24 = scalar_lea.hbm %s978_s0, %s409_s13 }
  0x5b   : > { %s192_s26 = scalar_lea.vmem [#allocation2], %s408_s30  ;;  %p876_p11 = pnand %p459_p2, %p38_p1 }
  0x5c   : > { %s199_s29 = sshll.u32 %s192_s26, 4  ;;  %s189_s27 = scalar_lea.sflag [#allocation3], %s188_s12  ;;  %s880_s29 = int_to_ptr.vmem [resolvable:$true] %s199_s29 }
  0x5d   : > { %s585_s6 = scalar_lea.hbm %s874_s24, 64  ;;  %p587_p0 = pneg %p876_p11 }
  0x5e   : > { %p586_p8 = scmp.ne.s32.totalorder %s874_s24, %s585_s6  ;;  %s590_s28 = scalar_lea.hbm %s978_s0, 128 }
  0x5f   : > { %p591_p7 = scmp.lt.u32.totalorder %s874_s24, %s978_s0  ;;  %p592_p10 = scmp.lt.u32.totalorder %s590_s28, %s585_s6 }
  0x60   : > { %p588_p3 = pnand %p587_p0, %p586_p8  ;;  %p594_p9 = scmp.lt.u32.totalorder %s585_s6, %s874_s24 }
  0x61   : > { %p593_p13 = por %p592_p10, %p591_p7 }
  0x62   : > { %p589_p5 = pneg %p588_p3 }
  0x63   : > { %p595_p12 = por %p594_p9, %p593_p13 }
  0x65   : > { %p596_p2 = pnand %p595_p12, %p589_p5 }
  0x67   : > { %599 = shalt.err (!%p596_p2)
}
  0x68   : > { %s600_s12 = scalar_lea.vmem %s880_s29, 64  ;;  %s694_s30 = smov [#allocation2]  }
  0x69   : > { %p601_p1 = scmp.ne.s32.totalorder %s880_s29, %s600_s12  ;;  %s605_s14 = sshll.u32 %s694_s30, 4  ;;  %s606_s14 = int_to_ptr.vmem [resolvable:$false] %s605_s14 }
  0x6a   : > { %s607_s20 = scalar_lea.vmem %s606_s14, 128  ;;  %p608_p3 = scmp.lt.s32.totalorder %s880_s29, %s606_s14 }
  0x6b   : > { %p603_p4 = pnand %p601_p1, %p587_p0  ;;  %p609_p7 = scmp.lt.s32.totalorder %s607_s20, %s600_s12 }
  0x6d   : > { %p604_p8 = pneg %p603_p4  ;;  %p610_p10 = por %p609_p7, %p608_p3 }
  0x6f   : > { %p611_p13 = pnand %p610_p10, %p604_p8 }
  0x71   : > { %614 = shalt.err (!%p611_p13)
}
  0x72   : > { %451 = dma.hbm_to_vmem [thread:$0]  (!%p876_p11), %s874_s24, 64, %s880_s29, %s189_s27  }
  0x73   : > { %p994_p5 = scmp.ne.s32.totalorder %s988_s23, 0 }
  0x74   : > { %s910_s26 = sand.u32 (!%p994_p5), 1, %s681_s16   ;;  %p995_p0 = scmp.ne.s32.totalorder (!%p994_p5), %s986_s21, 0 }
  0x75   : > { %208 = sbr.rel (%p994_p5) target bundleno = 466 (0x1d2), region = 36  ;;  %s411_s6 = sshll.u32 (!%p994_p5), %s910_s26, 2 }
  0x76   : > { %s211_s7 = scalar_lea.sflag (!%p994_p5), [#allocation3], %s910_s26  ;;  %s214_s8 = scalar_lea.vmem (!%p994_p5), [#allocation2], %s411_s6 }
  0x7c   : > { %660 = dma.done.wait (%p995_p0), %s211_s7, 64  }
  0x7d   : > { %662 = vsyncadd (%p995_p0), %s211_s7, 4294967232  ;;  %p996_p11 = scmp.eq.s32.totalorder %s742_s19, 0 }
  0x7f   : > { %664 = dma.done.wait (%p996_p11), [#allocation6], 144   ;;  %p997_p9 = pmov %p996_p11 }
  0x81   : > { %666 = vsyncadd (%p997_p9), [#allocation6], 4294967152  ;;  %p998_p12 = pmov %p997_p9 }
  0x82   : > { %p999_p2 = pmov %p997_p9 }
  0x83   : > { %668 = dma.done.wait (%p998_p12), [#allocation9], 16  }
  0x84   : > { %670 = vsyncadd (%p999_p2), [#allocation9], 4294967280  ;;  %v251_v0 = vld [vmem:[%s214_s8] sm:$0xf]  ;;  %v253_v1 = vld [vmem:[#allocation5] sm:$0xff]  ;;  %vm255_vm0 = vcmask 261120  }
  0x85   : > { %v252_v2 = vunpack.c.l.bf16 %v251_v0  ;;  %v416_v14 = vld [vmem:[#allocation7] ss:$0 sm:$0xff]  ;;  %v417_v16 = vld [vmem:[#allocation8] ss:$0 sm:$0xff]  ;;  %s419_s21 = sshll.u32 %s742_s19, 6  ;;  %s250_s23 = scalar_lea.vmem [#allocation10], %s411_s6 }
  0x86   : > { %s303_s24 = sshll.u32 %s250_s23, 4  ;;  %vm287_vm1 = vcmask 257024   ;;  %s934_s27 = scalar_lea.hbm %s982_s4, %s419_s21  ;;  %s936_s24 = int_to_ptr.vmem [resolvable:$true] %s303_s24 }
  0x87   : > { %v254_v3 = vadd.f32 %v253_v1, %v252_v2  ;;  %s290_s28 = scalar_lea.sflag [#allocation4], %s910_s26  ;;  %s615_s25 = scalar_lea.vmem %s936_s24, 64 }
  0x88   : > { %p616_p1 = scmp.ne.s32.totalorder %s936_s24, %s615_s25  ;;  %s695_s19 = smov [#allocation10]  }
  0x89   : > { %v256_v4 = vsel %vm255_vm0, %v254_v3, 0.0  ;;  %s619_s13 = sshll.u32 %s695_s19, 4  ;;  %s620_s13 = int_to_ptr.vmem [resolvable:$false] %s619_s13 }
  0x8a   : > { %257 = vadd.xlane.f32.xlu0 %v256_v4  ;;  %p617_p4 = pnand %p616_p1, %p865_p6  ;;  %s621_s12 = scalar_lea.vmem %s620_s13, 128 }
  0x8b   : > { %p622_p3 = scmp.lt.s32.totalorder %s936_s24, %s620_s13  ;;  %p623_p7 = scmp.lt.s32.totalorder %s621_s12, %s615_s25 }
  0x8c   : > { %p618_p8 = pneg %p617_p4 }
  0x8d   : > { %p624_p10 = por %p623_p7, %p622_p3 }
  0x8f   : > { %p625_p13 = pnand %p624_p10, %p618_p8 }
 0x117   : > { %v258_v5 = vpop.xlane.xlu0 %257 }
 0x118   : > { %v260_v6 = vmul.f32 0.03125, %v258_v5 }
 0x11a   : > { %v261_v7 = vsub.f32 %v254_v3, %v260_v6 }
 0x11c   : > { %v262_v8 = vmul.f32 %v261_v7, %v261_v7 }
 0x11e   : > { %v263_v9 = vsel %vm255_vm0, %v262_v8, 0.0 }
 0x11f   : > { %264 = vadd.xlane.f32.xlu0 %v263_v9 }
 0x1ac   : > { %v265_v10 = vpop.xlane.xlu0 %264 }
 0x1ad   : > { %v266_v11 = vmul.f32 0.03125, %v265_v10 }
 0x1af   : > { %v267_v12 = vadd.f32 1e-12, %v266_v11 }
 0x1b1   : > { %499 = vrsqrt.f32 %v267_v12 }
 0x1bb   : > { %v500_v13 = vpop.eup %499 }
 0x1bc   : > { %v269_v15 = vmul.f32 %v500_v13, %v261_v7 }
 0x1be   : > { %v277_v17 = vmul.f32 %v416_v14, %v269_v15 }
 0x1c0   : > { %v285_v18 = vadd.f32 %v417_v16, %v277_v17 }
 0x1c2   : > { %v286_v19 = vpack.c.bf16 %v285_v18, %v285_v18 }
 0x1c4   : > { %288 = vst.msk [vmem:[%s250_s23] sm:$0xf] %vm287_vm1, %v286_v19 }
 0x1c5   : > { %628 = shalt.err (!%p625_p13)
}
 0x1c6   : > { %s629_s30 = scalar_lea.hbm %s934_s27, 64  ;;  %s633_s26 = scalar_lea.hbm %s982_s4, 128 }
 0x1c7   : > { %p630_p5 = scmp.ne.s32.totalorder %s934_s27, %s629_s30  ;;  %p634_p9 = scmp.lt.u32.totalorder %s934_s27, %s982_s4 }
 0x1c8   : > { %p635_p12 = scmp.lt.u32.totalorder %s633_s26, %s629_s30  ;;  %p637_p1 = scmp.lt.u32.totalorder %s629_s30, %s934_s27 }
 0x1c9   : > { %p631_p0 = pnand %p630_p5, %p865_p6 }
 0x1ca   : > { %p636_p2 = por %p635_p12, %p634_p9 }
 0x1cb   : > { %p632_p11 = pneg %p631_p0 }
 0x1cc   : > { %p638_p4 = por %p637_p1, %p636_p2 }
 0x1ce   : > { %p639_p8 = pnand %p638_p4, %p632_p11 }
 0x1d0   : > { %642 = shalt.err (!%p639_p8)
}
 0x1d1   : > { %436 = dma.vmem_to_hbm [thread:$0]  (%p865_p6), %s936_s24, 64, %s934_s27, %s290_s28  }
 0x1d2 PF: > { %s315_s8 = sand.u32 1, %s677_s15   ;;  %p1000_p3 = scmp.ne.s32.totalorder %s987_s22, 0 }
 0x1d3   : > { %p1001_p7 = scmp.ge.s32.totalorder %s689_s18, 2  ;;  %s316_s21 = scalar_lea.sflag [#allocation4], %s315_s8 }
 0x1d5   : > { %p453_p10 = pnand %p1001_p7, %p1000_p3 }
 0x1d7   : > { %672 = dma.done.wait (!%p453_p10), %s316_s21, 64  }
 0x1d8   : > { %674 = vsyncadd (!%p453_p10), %s316_s21, 4294967232  ;;  %p19_p13 = scmp.ge.s32.totalorder %s851_s10, 4   ;;  %s1002_s15 = smov %s681_s16 }
 0x1d9   : > { %s1003_s16 = smov %s685_s17  ;;  %s1004_s17 = smov %s861_s9 }
 0x1da   : > { %s1005_s18 = smov %s851_s10  ;;  %21 = sbr.rel (!%p19_p13) target bundleno = 7 (0x7), region = 93 }
 0x1e1   :  { %321 = vsyncpa [#allocation3], 1 }
 0x1e2   :  { %323 = vsyncpa [#allocation3 + $0x1], 1 }
 0x1e3   :  { %324 = vsyncpa [#allocation6], 1 }
 0x1e4   :  { %325 = vsyncpa [#allocation9], 1 }
 0x1e5   :  { %326 = vsyncpa [#allocation4], 1 }
 0x1e6   :  { %328 = vsyncpa [#allocation4 + $0x1], 1 }

// kernel: bert_forward.11
= control target key start
LH: loop header
LB: loop body
LE: loop exit
PB: predicated region body
PF: predicated region fallthrough
CT: control target
= control target key end

     0   :  { %s2455_s0 = inlined_call_operand.hbm [shape: bf16[16,96], index: 0, kind: input, shape index: {}, may-alias: {0,1}]   ;;  %s2456_s1 = inlined_call_operand.hbm [shape: bf16[16,96], index: 1, kind: input, shape index: {}, may-alias: {0,1}]   ;;  %s2457_s2 = inlined_call_operand.hbm [shape: f32[2,1,8], index: 2, kind: input, shape index: {}]   ;;  %s2458_s3 = inlined_call_operand.hbm [shape: bf16[32,32], index: 3, kind: input, shape index: {}]   ;;  %s2459_s4 = inlined_call_operand.hbm [shape: f32[1,32], index: 4, kind: input, shape index: {}]   ;;  %s2460_s5 = inlined_call_operand.hbm [shape: bf16[16,32], index: 5, kind: input, shape index: {}]   ;;  %s2461_s6 = inlined_call_operand.hbm [shape: f32[1,32], index: 6, kind: input, shape index: {}]   ;;  %s2462_s7 = inlined_call_operand.hbm [shape: f32[1,32], index: 7, kind: input, shape index: {}]   ;;  %s2463_s8 = inlined_call_operand.hbm [shape: bf16[16,32], index: 8, kind: output, shape index: {}]  }
   0x1   :  { %2482 = sst [smem:[#allocation31_spill]] %s2455_s0 }
   0x2   :  { %2483 = sst [smem:[#allocation32_spill]] %s2456_s1 }
   0x3   :  { %2484 = sst [smem:[#allocation33_spill]] %s2458_s3 }
   0x4   :  { %2485 = sst [smem:[#allocation34_spill]] %s2461_s6 }
   0x5   :  { %2486 = sst [smem:[#allocation35_spill]] %s2463_s8 }
   0x6   :  { %13 = vsyncpa [#allocation3], 0 }
   0x7   :  { %15 = vsyncpa [#allocation3 + $0x1], 0 }
   0x8   :  { %16 = vsyncpa [#allocation6], 0 }
   0x9   :  { %18 = vsyncpa [#allocation6 + $0x1], 0 }
   0xa   :  { %19 = vsyncpa [#allocation9], 0 }
   0xb   :  { %20 = vsyncpa [#allocation12], 0 }
   0xc   :  { %22 = vsyncpa [#allocation12 + $0x1], 0 }
   0xd   :  { %23 = vsyncpa [#allocation15], 0 }
   0xe   :  { %24 = vsyncpa [#allocation4], 0 }
   0xf   :  { %26 = vsyncpa [#allocation4 + $0x1], 0  ;;  %s1971_s27 = smov 0   ;;  %s1973_s28 = smov 0  }
  0x10   :  { %s1975_s29 = smov 0   ;;  %s1977_s30 = smov 0  }
  0x11   :  { %s1979_s9 = smov 0   ;;  %s1981_s10 = smov 0  }
  0x12 LB: > { %2487 = sst [smem:[#allocation24_spill]] %s1877_s27  ;;  %s2002_s11 = sadd.s32 4294967295, %s1897_s10   ;;  %s1897_s10 = sphi %s1981_s10, %s32_s10   ;;  %s1893_s9 = sphi %s1979_s9, %s2535_s9   ;;  %s1889_s30 = sphi %s1977_s30, %s2534_s30   ;;  %s1885_s29 = sphi %s1975_s29, %s2530_s29   ;;  %s1881_s28 = sphi %s1973_s28, %s2533_s28   ;;  %s1877_s27 = sphi %s1971_s27, %s2532_s27  }
  0x13   : > { %2488 = sst [smem:[#allocation25_spill]] %s1885_s29  ;;  %s1288_s12 = sadd.s32 4294967294, %s1897_s10  }
  0x14   : > { %2489 = sst [smem:[#allocation26_spill]] %s1889_s30  ;;  %p66_p0 = scmp.ne.s32.totalorder %s1881_s28, %s1877_s27 }
  0x15   : > { %p2464_p1 = scmp.eq.s32.totalorder %s2002_s11, 0  ;;  %p262_p3 = scmp.eq.s32.totalorder %s1288_s12, 1 }
  0x16   : > { %p1289_p5 = scmp.ge.s32.totalorder %s1897_s10, 1  ;;  %p269_p7 = scmp.lt.s32.totalorder %s1897_s10, 3 }
  0x17   : > { %p2011_p4 = por %p2464_p1, %p66_p0  ;;  %p2016_p6 = por %p262_p3, %p66_p0 }
  0x18   : > { %p2021_p8 = pnand %p1289_p5, %p269_p7  ;;  %s1899_s16 = smov [#allocation8]  }
  0x19   : > { %s2490_s13 = scalar_select %p2011_p4, 1, 0 }
  0x1a   : > { %s2491_s14 = scalar_select %p2016_p6, 1, 0 }
  0x1b   : > { %s2493_s15 = scalar_select %p2021_p8, 1, 0 }
  0x1c   : > { %2492 = sst [smem:[#allocation27_spill]] %s2491_s14  ;;  %s281_s17 = sshll.u32 %s1899_s16, 4  ;;  %s2025_s17 = int_to_ptr.vmem [resolvable:$true] %s281_s17 }
  0x1d   : > { %p1432_p9 = pneg %p2021_p8  ;;  %s1900_s19 = smov [#allocation13]  }
  0x1e   : > { %s306_s20 = sshll.u32 %s1900_s19, 4  ;;  %s2495_s3 = sld [smem:[#allocation33_spill]]  ;;  %s2036_s20 = int_to_ptr.vmem [resolvable:$true] %s306_s20 }
  0x1f   : > { %p2032_p11 = pnand %p1432_p9, %p2464_p1 }
  0x21   : > { %s2494_s18 = scalar_select %p2032_p11, 1, 0 }
  0x22   : > { %p2046_p13 = pneg %p2032_p11 }
  0x24   : > { %s1563_s23 = scalar_lea.hbm %s2495_s3, 256 }
  0x25   : > { %p1564_p12 = scmp.ne.s32.totalorder %s2495_s3, %s1563_s23  ;;  %p1570_p5 = scmp.lt.u32.totalorder %s1563_s23, %s2495_s3 }
  0x26   : > { %s2496_s26 = scalar_select %p2046_p13, 1, 0 }
  0x27   : > { %p1566_p0 = pnand %p2046_p13, %p1564_p12 }
  0x29   : > { %p1567_p3 = pneg %p1566_p0 }
  0x2b   : > { %p1572_p7 = pnand %p1570_p5, %p1567_p3 }
  0x2d   : > { %1575 = shalt.err (!%p1572_p7)
}
  0x2e   : > { %s1576_s19 = scalar_lea.vmem %s2025_s17, 256  ;;  %p1584_p2 = scmp.lt.s32.totalorder %s2025_s17, %s2025_s17 }
  0x2f   : > { %p1577_p9 = scmp.ne.s32.totalorder %s2025_s17, %s1576_s19  ;;  %p1585_p6 = scmp.lt.s32.totalorder %s1576_s19, %s1576_s19 }
  0x31   : > { %p1579_p10 = pnand %p1577_p9, %p2046_p13  ;;  %p1586_p12 = por %p1585_p6, %p1584_p2 }
  0x33   : > { %p1580_p1 = pneg %p1579_p10 }
  0x35   : > { %p1587_p0 = pnand %p1586_p12, %p1580_p1 }
  0x37   : > { %1590 = shalt.err (!%p1587_p0)
}
  0x38   : > { %s1901_s21 = smov 64   ;;  %s1902_s22 = smov 4  }
  0x39   : > { %1435 = dma.hbm_to_vmem [thread:$0]  (!%p2032_p11), %s2495_s3, 256, %s2025_s17, [#allocation9], %s1901_s21, %s1901_s21, %s1902_s22  }
  0x3a   : > { %s2497_s6 = sld [smem:[#allocation34_spill]] }
  0x40   : > { %s1591_s16 = scalar_lea.hbm %s2497_s6, 16 }
  0x41   : > { %p1592_p2 = scmp.ne.s32.totalorder %s2497_s6, %s1591_s16  ;;  %p1598_p10 = scmp.lt.u32.totalorder %s1591_s16, %s2497_s6 }
  0x43   : > { %p1594_p1 = pnand %p1592_p2, %p2046_p13 }
  0x45   : > { %p1595_p6 = pneg %p1594_p1 }
  0x47   : > { %p1600_p3 = pnand %p1598_p10, %p1595_p6 }
  0x49   : > { %1603 = shalt.err (!%p1600_p3)
}
  0x4a   : > { %s1604_s17 = scalar_lea.vmem %s2036_s20, 16  ;;  %s1611_s27 = scalar_lea.vmem %s2036_s20, 32 }
  0x4b   : > { %p1605_p5 = scmp.ne.s32.totalorder %s2036_s20, %s1604_s17  ;;  %p1612_p12 = scmp.lt.s32.totalorder %s2036_s20, %s2036_s20 }
  0x4c   : > { %p1613_p0 = scmp.lt.s32.totalorder %s1611_s27, %s1604_s17 }
  0x4d   : > { %p1607_p7 = pnand %p1605_p5, %p2046_p13 }
  0x4e   : > { %p1614_p2 = por %p1613_p0, %p1612_p12 }
  0x4f   : > { %p1608_p9 = pneg %p1607_p7 }
  0x51   : > { %p1615_p1 = pnand %p1614_p2, %p1608_p9 }
  0x53   : > { %1618 = shalt.err (!%p1615_p1)
}
  0x54   : > { %1441 = dma.hbm_to_vmem [thread:$0]  (!%p2032_p11), %s2497_s6, 16, %s2036_s20, [#allocation12]  }
  0x55   : > { %s44_s21 = sadd.s32 1, %s1893_s9  ;;  %s53_s22 = sadd.s32 1, %s1885_s29 }
  0x56   : > { %p46_p6 = scmp.ge.s32.totalorder %s44_s21, 2  ;;  %p60_p10 = scmp.ne.s32.totalorder %s1885_s29, %s1881_s28 }
  0x57   : > { %p61_p3 = scmp.eq.s32.totalorder %s1897_s10, 0  ;;  %p1466_p5 = scmp.lt.s32.totalorder %s1897_s10, 2 }
  0x58   : > { %s2537_s21 = smov (%p46_p6, %s44_s21), 0  ;;  %p2499_p9 = scmp.eq.s32.totalorder %s2002_s11, 1 }
  0x59   : > { %2498 = sst [smem:[#allocation28_spill]] %s2537_s21  ;;  %p62_p7 = por %p61_p3, %p60_p10 }
  0x5a   : > { %p2101_p12 = por %p2499_p9, %p60_p10  ;;  %s50_s24 = ssub.s32 %s1893_s9, %s2537_s21 }
  0x5b   : > { %s2108_s20 = sand.u32 1, %s1885_s29   ;;  %p51_p0 = scmp.eq.s32.totalorder %s50_s24, 0 }
  0x5c   : > { %s2500_s23 = scalar_select %p2101_p12, 1, 0 }
  0x5d   : > { %s2111_s25 = sshll.u32 %s2108_s20, 2  ;;  %s2114_s12 = sshll.u32 %s1893_s9, 6 }
  0x5e   : > { %2501 = sst [smem:[#allocation29_spill]] %s2500_s23  ;;  %p2116_p2 = pnand %p1466_p5, %p62_p7 }
  0x5f   : > { %s2121_s19 = scalar_select %p51_p0, %s1885_s29, %s53_s22  }
  0x60   : > { %s2502_s16 = scalar_select %p2116_p2, 1, 0 }
  0x61   : > { %2503 = sst [smem:[#allocation30_spill]] %s2121_s19  ;;  %s2472_s17 = sand.u32 1, %s1897_s10  }
  0x62   : > { %s2504_s1 = sld [smem:[#allocation32_spill]]  ;;  %s351_s24 = scalar_lea.vmem [#allocation5], %s2111_s25 }
  0x63   : > { %s358_s3 = sshll.u32 %s351_s24, 4  ;;  %s2135_s6 = scalar_lea.sflag [#allocation6], %s2472_s17  ;;  %s2131_s3 = int_to_ptr.vmem [resolvable:$true] %s358_s3 }
  0x64   : > { %p2141_p6 = pneg %p2116_p2 }
  0x68   : > { %s2128_s14 = scalar_lea.hbm %s2504_s1, %s2114_s12  ;;  %s1624_s24 = scalar_lea.hbm %s2504_s1, 128 }
  0x69   : > { %s1619_s21 = scalar_lea.hbm %s2128_s14, 64  ;;  %p1625_p5 = scmp.lt.u32.totalorder %s2128_s14, %s2504_s1 }
  0x6a   : > { %p1620_p1 = scmp.ne.s32.totalorder %s2128_s14, %s1619_s21  ;;  %p1626_p7 = scmp.lt.u32.totalorder %s1624_s24, %s1619_s21 }
  0x6b   : > { %p1628_p0 = scmp.lt.u32.totalorder %s1619_s21, %s2128_s14 }
  0x6c   : > { %p1622_p10 = pnand %p2141_p6, %p1620_p1  ;;  %p1627_p9 = por %p1626_p7, %p1625_p5 }
  0x6e   : > { %p1623_p3 = pneg %p1622_p10  ;;  %p1629_p12 = por %p1628_p0, %p1627_p9 }
  0x70   : > { %p1630_p4 = pnand %p1629_p12, %p1623_p3 }
  0x72   : > { %1633 = shalt.err (!%p1630_p4)
}
  0x73   : > { %s1634_s17 = scalar_lea.vmem %s2131_s3, 64  ;;  %s1903_s27 = smov [#allocation5]  }
  0x74   : > { %p1635_p1 = scmp.ne.s32.totalorder %s2131_s3, %s1634_s17  ;;  %s1639_s8 = sshll.u32 %s1903_s27, 4  ;;  %s1640_s8 = int_to_ptr.vmem [resolvable:$false] %s1639_s8 }
  0x75   : > { %s1641_s29 = scalar_lea.vmem %s1640_s8, 128  ;;  %p1642_p11 = scmp.lt.s32.totalorder %s2131_s3, %s1640_s8 }
  0x76   : > { %p1637_p10 = pnand %p1635_p1, %p2141_p6  ;;  %p1643_p13 = scmp.lt.s32.totalorder %s1641_s29, %s1634_s17 }
  0x78   : > { %p1638_p8 = pneg %p1637_p10  ;;  %p1644_p5 = por %p1643_p13, %p1642_p11 }
  0x7a   : > { %p1645_p7 = pnand %p1644_p5, %p1638_p8 }
  0x7c   : > { %1648 = shalt.err (!%p1645_p7)
}
  0x7d   : > { %1451 = dma.hbm_to_vmem [thread:$0]  (!%p2116_p2), %s2128_s14, 64, %s2131_s3, %s2135_s6  }
  0x7e   : > { %s1904_s21 = smov [#allocation10]   ;;  %s1905_s24 = smov [#allocation14]  }
  0x7f   : > { %s295_s19 = sshll.u32 %s1904_s21, 4  ;;  %s317_s1 = sshll.u32 %s1905_s24, 4  ;;  %s296_s19 = int_to_ptr.vmem [resolvable:$true] %s295_s19  ;;  %s2165_s1 = int_to_ptr.vmem [resolvable:$true] %s317_s1 }
  0x80   : > { %s1649_s17 = scalar_lea.hbm %s2459_s4, 16  ;;  %p2506_p8 = scmp.ne.s32.totalorder %s2496_s26, 0 }
  0x81   : > { %p1650_p4 = scmp.ne.s32.totalorder %s2459_s4, %s1649_s17  ;;  %p1656_p12 = scmp.lt.u32.totalorder %s1649_s17, %s2459_s4 }
  0x83   : > { %p1652_p11 = pnand %p1650_p4, %p2506_p8 }
  0x85   : > { %p1653_p13 = pneg %p1652_p11 }
  0x87   : > { %p1658_p3 = pnand %p1656_p12, %p1653_p13 }
  0x89   : > { %1661 = shalt.err (!%p1658_p3)
}
  0x8a   : > { %s1662_s14 = scalar_lea.vmem %s296_s19, 16  ;;  %s1669_s21 = scalar_lea.vmem %s296_s19, 32 }
  0x8b   : > { %p1663_p9 = scmp.ne.s32.totalorder %s296_s19, %s1662_s14  ;;  %p1670_p10 = scmp.lt.s32.totalorder %s296_s19, %s296_s19 }
  0x8c   : > { %p1671_p5 = scmp.lt.s32.totalorder %s1669_s21, %s1662_s14 }
  0x8d   : > { %p1665_p0 = pnand %p1663_p9, %p2506_p8 }
  0x8e   : > { %p1672_p7 = por %p1671_p5, %p1670_p10 }
  0x8f   : > { %p1666_p1 = pneg %p1665_p0 }
  0x91   : > { %p1673_p2 = pnand %p1672_p7, %p1666_p1 }
  0x93   : > { %1676 = shalt.err (!%p1673_p2)
}
  0x94   : > { %p2507_p4 = scmp.ne.s32.totalorder %s2494_s18, 0  ;;  %s1677_s8 = scalar_lea.hbm %s2462_s7, 16 }
  0x95   : > { %p1678_p11 = scmp.ne.s32.totalorder %s2462_s7, %s1677_s8  ;;  %p1684_p2 = scmp.lt.u32.totalorder %s1677_s8, %s2462_s7 }
  0x96   : > { %1438 = dma.hbm_to_vmem [thread:$0]  (!%p2507_p4), %s2459_s4, 16, %s296_s19, [#allocation9]  }
  0x97   : > { %p1680_p13 = pnand %p1678_p11, %p2506_p8 }
  0x99   : > { %p1681_p12 = pneg %p1680_p13 }
  0x9b   : > { %p1686_p3 = pnand %p1684_p2, %p1681_p12 }
  0x9d   : > { %1689 = shalt.err (!%p1686_p3)
}
  0x9e   : > { %s1690_s19 = scalar_lea.vmem %s2165_s1, 16  ;;  %s1697_s21 = scalar_lea.vmem %s2165_s1, 32 }
  0x9f   : > { %p1691_p9 = scmp.ne.s32.totalorder %s2165_s1, %s1690_s19  ;;  %p1698_p10 = scmp.lt.s32.totalorder %s2165_s1, %s2165_s1 }
  0xa0   : > { %p1699_p5 = scmp.lt.s32.totalorder %s1697_s21, %s1690_s19 }
  0xa1   : > { %p1693_p0 = pnand %p1691_p9, %p2506_p8 }
  0xa2   : > { %p1700_p7 = por %p1699_p5, %p1698_p10 }
  0xa3   : > { %p1694_p1 = pneg %p1693_p0 }
  0xa5   : > { %p1701_p11 = pnand %p1700_p7, %p1694_p1 }
  0xa7   : > { %1704 = shalt.err (!%p1701_p11)
}
  0xa8   : > { %1444 = dma.hbm_to_vmem [thread:$0]  (!%p2507_p4), %s2462_s7, 16, %s2165_s1, [#allocation15]  }
  0xa9   : > { %s2508_s0 = sld [smem:[#allocation31_spill]]  ;;  %s332_s8 = scalar_lea.vmem [#allocation2], %s2111_s25 }
  0xaa   : > { %s340_s18 = sshll.u32 %s332_s8, 4  ;;  %s329_s17 = scalar_lea.sflag [#allocation3], %s2108_s20  ;;  %s341_s18 = int_to_ptr.vmem [resolvable:$true] %s340_s18 }
  0xaf   : > { %s2213_s27 = scalar_lea.hbm %s2508_s0, %s2114_s12  ;;  %s1710_s14 = scalar_lea.hbm %s2508_s0, 128 }
  0xb0   : > { %s1705_s29 = scalar_lea.hbm %s2213_s27, 64  ;;  %p1711_p4 = scmp.lt.u32.totalorder %s2213_s27, %s2508_s0 }
  0xb1   : > { %p1706_p8 = scmp.ne.s32.totalorder %s2213_s27, %s1705_s29  ;;  %p1712_p2 = scmp.lt.u32.totalorder %s1710_s14, %s1705_s29 }
  0xb2   : > { %p1714_p9 = scmp.lt.u32.totalorder %s1705_s29, %s2213_s27 }
  0xb3   : > { %p1708_p13 = pnand %p1706_p8, %p2141_p6  ;;  %p1713_p3 = por %p1712_p2, %p1711_p4 }
  0xb5   : > { %p1709_p12 = pneg %p1708_p13  ;;  %p1715_p0 = por %p1714_p9, %p1713_p3 }
  0xb7   : > { %p1716_p1 = pnand %p1715_p0, %p1709_p12 }
  0xb9   : > { %1719 = shalt.err (!%p1716_p1)
}
  0xba   : > { %s1720_s23 = scalar_lea.vmem %s341_s18, 64  ;;  %s1906_s24 = smov [#allocation2]  }
  0xbb   : > { %p1721_p10 = scmp.ne.s32.totalorder %s341_s18, %s1720_s23  ;;  %s1725_s26 = sshll.u32 %s1906_s24, 4  ;;  %s1726_s26 = int_to_ptr.vmem [resolvable:$false] %s1725_s26 }
  0xbc   : > { %s1727_s30 = scalar_lea.vmem %s1726_s26, 128  ;;  %p1728_p11 = scmp.lt.s32.totalorder %s341_s18, %s1726_s26 }
  0xbd   : > { %p1723_p5 = pnand %p1721_p10, %p2141_p6  ;;  %p1729_p8 = scmp.lt.s32.totalorder %s1727_s30, %s1720_s23 }
  0xbf   : > { %p1724_p7 = pneg %p1723_p5  ;;  %p1730_p13 = por %p1729_p8, %p1728_p11 }
  0xc1   : > { %p1731_p2 = pnand %p1730_p13, %p1724_p7 }
  0xc3   : > { %1734 = shalt.err (!%p1731_p2)
}
  0xc4   : > { %p2509_p4 = scmp.ne.s32.totalorder %s2502_s16, 0  ;;  %s1299_s8 = sshll.u32 %s1893_s9, 4 }
  0xc5   : > { %s368_s29 = scalar_lea.vmem [#allocation7], %s2108_s20  ;;  %s373_s19 = scalar_lea.hbm %s2457_s2, %s1299_s8 }
  0xc6   : > { %1448 = dma.hbm_to_vmem [thread:$0]  (!%p2509_p4), %s2213_s27, 64, %s341_s18, %s329_s17  }
  0xc7   : > { %s375_s3 = sshll.u32 %s368_s29, 4  ;;  %s1735_s21 = scalar_lea.hbm %s373_s19, 16  ;;  %s376_s3 = int_to_ptr.vmem [resolvable:$true] %s375_s3 }
  0xc8   : > { %p1736_p12 = scmp.ne.s32.totalorder %s373_s19, %s1735_s21  ;;  %s1740_s26 = scalar_lea.hbm %s2457_s2, 32 }
  0xc9   : > { %p1741_p0 = scmp.lt.u32.totalorder %s373_s19, %s2457_s2  ;;  %p1742_p1 = scmp.lt.u32.totalorder %s1740_s26, %s1735_s21 }
  0xca   : > { %p1738_p3 = pnand %p1736_p12, %p2141_p6  ;;  %p1744_p5 = scmp.lt.u32.totalorder %s1735_s21, %s373_s19 }
  0xcb   : > { %p1743_p10 = por %p1742_p1, %p1741_p0 }
  0xcc   : > { %p1739_p9 = pneg %p1738_p3 }
  0xcd   : > { %p1745_p7 = por %p1744_p5, %p1743_p10 }
  0xcf   : > { %p1746_p11 = pnand %p1745_p7, %p1739_p9 }
  0xd1   : > { %1749 = shalt.err (!%p1746_p11)
}
  0xd2   : > { %s1750_s20 = scalar_lea.vmem %s376_s3, 16  ;;  %s1907_s27 = smov [#allocation7]  }
  0xd3   : > { %p1751_p8 = scmp.ne.s32.totalorder %s376_s3, %s1750_s20  ;;  %s1755_s18 = sshll.u32 %s1907_s27, 4  ;;  %s1756_s18 = int_to_ptr.vmem [resolvable:$false] %s1755_s18 }
  0xd4   : > { %s1757_s17 = scalar_lea.vmem %s1756_s18, 32  ;;  %p1758_p12 = scmp.lt.s32.totalorder %s376_s3, %s1756_s18 }
  0xd5   : > { %p1753_p13 = pnand %p1751_p8, %p2141_p6  ;;  %p1759_p3 = scmp.lt.s32.totalorder %s1757_s17, %s1750_s20 }
  0xd7   : > { %p1754_p2 = pneg %p1753_p13  ;;  %p1760_p4 = por %p1759_p3, %p1758_p12 }
  0xd9   : > { %p1761_p0 = pnand %p1760_p4, %p1754_p2 }
  0xdb   : > { %1764 = shalt.err (!%p1761_p0)
}
  0xdc   : > { %p2510_p1 = scmp.ne.s32.totalorder %s2502_s16, 0  ;;  %s2256_s29 = scalar_lea.hbm %s2460_s5, %s2114_s12 }
  0xdd   : > { %s386_s1 = scalar_lea.vmem [#allocation11], %s2111_s25  ;;  %s2511_s21 = sand.u32 1, %s1897_s10  }
  0xde   : > { %1454 = dma.hbm_to_vmem [thread:$0]  (!%p2510_p1), %s373_s19, 16, %s376_s3, %s2135_s6  }
  0xdf   : > { %s394_s14 = sshll.u32 %s386_s1, 4  ;;  %s383_s23 = scalar_lea.sflag [#allocation12], %s2511_s21  ;;  %s395_s14 = int_to_ptr.vmem [resolvable:$true] %s394_s14 }
  0xe0   : > { %s1765_s24 = scalar_lea.hbm %s2256_s29, 64  ;;  %s1770_s19 = scalar_lea.hbm %s2460_s5, 128 }
  0xe1   : > { %p1766_p4 = scmp.ne.s32.totalorder %s2256_s29, %s1765_s24  ;;  %p1771_p5 = scmp.lt.u32.totalorder %s2256_s29, %s2460_s5 }
  0xe2   : > { %p1772_p7 = scmp.lt.u32.totalorder %s1770_s19, %s1765_s24  ;;  %p1774_p8 = scmp.lt.u32.totalorder %s1765_s24, %s2256_s29 }
  0xe3   : > { %p1768_p9 = pnand %p1766_p4, %p2141_p6 }
  0xe4   : > { %p1773_p11 = por %p1772_p7, %p1771_p5 }
  0xe5   : > { %p1769_p10 = pneg %p1768_p9 }
  0xe6   : > { %p1775_p13 = por %p1774_p8, %p1773_p11 }
  0xe8   : > { %p1776_p2 = pnand %p1775_p13, %p1769_p10 }
  0xea   : > { %1779 = shalt.err (!%p1776_p2)
}
  0xeb   : > { %s1780_s25 = scalar_lea.vmem %s395_s14, 64  ;;  %s1908_s30 = smov [#allocation11]  }
  0xec   : > { %p1781_p12 = scmp.ne.s32.totalorder %s395_s14, %s1780_s25  ;;  %s1785_s20 = sshll.u32 %s1908_s30, 4  ;;  %s1786_s20 = int_to_ptr.vmem [resolvable:$false] %s1785_s20 }
  0xed   : > { %s1787_s27 = scalar_lea.vmem %s1786_s20, 128  ;;  %p1788_p4 = scmp.lt.s32.totalorder %s395_s14, %s1786_s20 }
  0xee   : > { %p1783_p3 = pnand %p1781_p12, %p2141_p6  ;;  %p1789_p9 = scmp.lt.s32.totalorder %s1787_s27, %s1780_s25 }
  0xf0   : > { %p1784_p0 = pneg %p1783_p3  ;;  %p1790_p1 = por %p1789_p9, %p1788_p4 }
  0xf2   : > { %p1791_p5 = pnand %p1790_p1, %p1784_p0 }
  0xf4   : > { %1794 = shalt.err (!%p1791_p5)
}
  0xf5   : > { %p2512_p7 = scmp.ne.s32.totalorder %s2502_s16, 0  ;;  %p2513_p10 = scmp.ne.s32.totalorder %s2493_s15, 0 }
  0xf6   : > { %s2281_s22 = sand.u32 (!%p2513_p10), 1, %s1881_s28   ;;  %p2514_p6 = scmp.ne.s32.totalorder (!%p2513_p10), %s2490_s13, 0 }
  0xf7   : > { %1457 = dma.hbm_to_vmem [thread:$0]  (!%p2512_p7), %s2256_s29, 64, %s395_s14, %s383_s23  }
  0xf8   : > { %403 = sbr.rel (%p2513_p10) target bundleno = 2093 (0x82d), region = 52  ;;  %s2284_s18 = sshll.u32 (!%p2513_p10), %s2281_s22, 2 }
  0xf9   : > { %s406_s17 = scalar_lea.sflag (!%p2513_p10), [#allocation3], %s2281_s22  ;;  %s409_s0 = scalar_lea.vmem (!%p2513_p10), [#allocation2], %s2284_s18 }
  0xff   : > { %1848 = dma.done.wait (%p2514_p6), %s406_s17, 64  }
 0x100   : > { %1850 = vsyncadd (%p2514_p6), %s406_s17, 4294967232  ;;  %s414_s15 = sand.u32 1, %s2002_s11   ;;  %s418_s8 = scalar_lea.vmem [#allocation5], %s2284_s18 }
 0x101   : > { %s415_s16 = scalar_lea.sflag [#allocation6], %s414_s15 }
 0x102   : > { %1852 = dma.done.wait (%p2514_p6), %s415_s16, 80  }
 0x103   : > { %1854 = vsyncadd (%p2514_p6), %s415_s16, 4294967216  ;;  %s426_s29 = scalar_lea.vmem [#allocation7], %s2281_s22  ;;  %p2515_p1 = scmp.eq.s32.totalorder %s2002_s11, 0 }
 0x105   : > { %1856 = dma.done.wait (%p2515_p1), [#allocation9], 272   ;;  %p2516_p11 = pmov %p2515_p1 }
 0x106   : > { %s440_s1 = scalar_lea.sflag [#allocation12], %s414_s15  ;;  %s443_s14 = scalar_lea.vmem [#allocation11], %s2284_s18 }
 0x107   : > { %1858 = vsyncadd (%p2516_p11), [#allocation9], 4294967024 }
 0x108   : > { %1860 = dma.done.wait (%p2514_p6), %s440_s1, 64  }
 0x109   : > { %1862 = vsyncadd (%p2514_p6), %s440_s1, 4294967232  ;;  %p2517_p8 = pmov %p2515_p1 }
 0x10a   : > { %p2518_p13 = pmov %p2515_p1 }
 0x10b   : > { %1864 = dma.done.wait (%p2517_p8), [#allocation12], 16  }
 0x10c   : > { %1866 = vsyncadd (%p2518_p13), [#allocation12], 4294967280  ;;  %p2519_p2 = pmov %p2515_p1 }
 0x10d   : > { %p2520_p12 = pmov %p2515_p1 }
 0x10e   : > { %1868 = dma.done.wait (%p2519_p2), [#allocation15], 16  }
 0x10f   : > { %1870 = vsyncadd (%p2520_p12), [#allocation15], 4294967280  ;;  %v1909_v0 = vmov 0.0   ;;  %vm1910_vm0 = vmmov 0   ;;  %v2322_v1 = vld [vmem:[%s418_s8] ss:$0 sps:$4 sm:$0xff]   ;;  %v510_v7 = vlaneseq }
 0x110   : > { %1350 = vmatprep.subr.bf16.mxu0 %v1909_v0  ;;  %1352 = vmatprep.mubr.msk.bf16.mxu0 %vm1910_vm0, %v1909_v0  ;;  %s1911_s13 = smov 96   ;;  %vm520_vm1 = vcmask 64512   ;;  %v506_v4 = vld [vmem:[%s409_s0] sm:$0xf]  ;;  %s1912_s11 = smov 64   ;;  %vm585_vm2 = vcmask 1043456  }
 0x111   : > { %1356 = vmatprep.subr.bf16.mxu1 %v1909_v0  ;;  %1358 = vmatprep.mubr.msk.bf16.mxu1 %vm1910_vm0, %v1909_v0  ;;  %v507_v5 = vmul.bf16 1052065461, %v506_v4  ;;  %s1913_s21 = smov 88   ;;  %s1914_s23 = smov 120   ;;  %v503_v8 = vld [vmem:[%s426_s29] sm:$0x1] }
 0x112   : > { %518 = vrot.lane.b32.xlu0 %v2322_v1, %s1911_s13  ;;  %580 = vrot.lane.b32.xlu1 %v2322_v1, %s1912_s11  ;;  %s1915_s24 = smov 80   ;;  %s1916_s6 = smov 112   ;;  %v504_v9 = vsub.f32 1.0, %v503_v8  ;;  %v511_v10 = vshrl.u32 %v510_v7, 7  ;;  %vm982_vm3 = vcmask 130048   ;;  %vm984_vm4 = vcmask 195584  }
 0x113   : > { %v1314_v6 = vcombine.low %v507_v5, %v507_v5  ;;  %s1917_s3 = smov 72   ;;  %s1918_s19 = smov 104   ;;  %vm1010_vm5 = vcmask 261120   ;;  %vm1088_vm6 = vcmask 257024  }
 0x114   : > { %v505_v11 = vmul.f32 -10000.0, %v504_v9  ;;  %v512_v12 = vsub.s32 0, %v511_v10  ;;  %s1919_s12 = smov 48   ;;  %s1920_s26 = smov 56  }
 0x115   : > { %s1921_s25 = smov 40   ;;  %s1922_s30 = smov 8  }
 0x116   : > { %635 = vrot.lane.b32.xlu1 %v2322_v1, %s1913_s21  ;;  %v2338_v13 = vrot.slane %v505_v11, %v512_v12  ;;  %s1923_s20 = smov 16   ;;  %s1924_s27 = smov 24  }
 0x117   : > { %s2521_s17 = sld [smem:[#allocation26_spill]]  ;;  %s2522_s0 = sld [smem:[#allocation29_spill]] }
 0x118   : > { %s497_s16 = scalar_lea.vmem [#allocation16], %s2284_s18  ;;  %s1091_s11 = scalar_lea.sflag [#allocation4], %s2281_s22 }
 0x119   : > { %s1105_s8 = sshll.u32 %s497_s16, 4  ;;  %s1925_s18 = smov [#allocation16]   ;;  %s2408_s8 = int_to_ptr.vmem [resolvable:$true] %s1105_s8 }
 0x11a   : > { %633 = vrot.lane.b32.xlu1 %v1314_v6, %s1914_s23  ;;  %s1795_s21 = scalar_lea.vmem %s2408_s8, 64  ;;  %s1799_s23 = sshll.u32 %s1925_s18, 4  ;;  %s1800_s23 = int_to_ptr.vmem [resolvable:$false] %s1799_s23 }
 0x11b   : > { %p1796_p3 = scmp.ne.s32.totalorder %s2408_s8, %s1795_s21  ;;  %p1802_p5 = scmp.lt.s32.totalorder %s2408_s8, %s1800_s23 }
 0x11d   : > { %s1328_s15 = sshll.u32 %s2521_s17, 6  ;;  %p2524_p0 = scmp.ne.s32.totalorder %s2522_s0, 0 }
 0x11e   : > { %747 = vrot.lane.b32.xlu1 %v2322_v1, %s1915_s24  ;;  %s1801_s24 = scalar_lea.vmem %s1800_s23, 128 }
 0x11f   : > { %p1797_p4 = pnand %p1796_p3, %p2524_p0  ;;  %p1803_p7 = scmp.lt.s32.totalorder %s1801_s24, %s1795_s21 }
 0x121   : > { %p1798_p9 = pneg %p1797_p4  ;;  %p1804_p10 = por %p1803_p7, %p1802_p5 }
 0x122   : > { %745 = vrot.lane.b32.xlu1 %v1314_v6, %s1916_s6 }
 0x123   : > { %p1805_p6 = pnand %p1804_p10, %p1798_p9 }
 0x126   : > { %859 = vrot.lane.b32.xlu1 %v2322_v1, %s1917_s3 }
 0x12a   : > { %857 = vrot.lane.b32.xlu1 %v1314_v6, %s1918_s19 }
 0x184   : > { %v519_v2 = vpop.permute.xlu0 %518  ;;  %v581_v20 = vpop.permute.xlu1 %580 }
 0x185   : > { %v525_v3 = vsel %vm520_vm1, %v519_v2, 0  ;;  %v587_v21 = vsel %vm585_vm2, %v581_v20, 0 }
 0x186   : > { %1351 = vmatpush3.bf16.xpose.msra.mxu0 %v525_v3  ;;  %1357 = vmatpush3.bf16.msra.mxu1 %v587_v21 }
 0x187   : > { %1368 = vmatprep.subr.bf16.mxu0 %v1909_v0  ;;  %1362 = vmatprep.subr.bf16.mxu1 %v1909_v0 }
 0x188   : > { %v636_v26 = vpop.permute.xlu1 %635 }
 0x189   : > { %v641_v28 = vsel %vm520_vm1, %v636_v26, 0  ;;  %v1543_v26 = vld [vmem:[#allocation8] sm:$0xff]  }
 0x18c   : > { %v634_v27 = vpop.permute.xlu1 %633 }
 0x18d   : > { %1353 = vmatmul.mubr.msk.bf16.vlgmr.msra.gmra.mrb[0].mxu0 %vm520_vm1, %v507_v5 }
 0x18e   : > { %1370 = vmatprep.mubr.msk.bf16.mxu0 %vm1910_vm0, %v1909_v0 }
 0x190   : > { %v748_v30 = vpop.permute.xlu1 %747 }
 0x191   : > { %v753_v31 = vsel %vm520_vm1, %v748_v30, 0  ;;  %v1544_v30 = vld [vmem:[#allocation8 + $0x8] sm:$0xff]  }
 0x194   : > { %v746_v32 = vpop.permute.xlu1 %745 }
 0x198   : > { %v860_v33 = vpop.permute.xlu1 %859 }
 0x199   : > { %v865_v34 = vsel %vm520_vm1, %v860_v33, 0 }
 0x19c   : > { %v858_v35 = vpop.permute.xlu1 %857 }
 0x260   : > { %v561_v14 = vpop.f32.mrb[0].mxu0 }
 0x261   : > { %v562_v15 = vadd.f32 %v561_v14, %v2338_v13  ;;  %v1354_v16 = vpop.f32.mrb[1].mxu0 }
 0x262   : > { %v564_v17 = vpop.f32.mrb[2].mxu0 }
 0x263   : > { %v1355_v18 = vpop.f32.mrb[3].mxu0  ;;  %v567_v19 = vsel %vm520_vm1, %v562_v15, -inf }
 0x264   : > { %568 = vmax.xlane.f32.xlu0 %v567_v19 }
 0x2f1   : > { %v569_v22 = vpop.xlane.xlu0 %568 }
 0x2f2   : > { %v570_v23 = vsub.f32 %v562_v15, %v569_v22 }
 0x2f4   : > { %v571_v24 = vpack.c.bf16 %v570_v23, %v570_v23 }
 0x2f6   : > { %v573_v25 = vmul.bf16 1069105081, %v571_v24 }
 0x2f8   : > { %1545 = vpow.bf16 %v573_v25 }
 0x303   : > { %v2345_v29 = vpop.eup %1545 }
 0x304   : > { %1359 = vmatmul.mubr.msk.bf16.vlgmr.msra.gmra.mrb[0].mxu1 %vm520_vm1, %v2345_v29  ;;  %v575_v22 = vunpack.c.l.bf16 %v2345_v29 }
 0x305   : > { %1363 = vmatpush3.bf16.xpose.msra.mxu1 %v641_v28  ;;  %1364 = vmatprep.mubr.msk.bf16.mxu1 %vm1910_vm0, %v1909_v0 }
 0x306   : > { %1374 = vmatprep.subr.bf16.mxu1 %v1909_v0  ;;  %v576_v23 = vsel %vm520_vm1, %v575_v22, 0.0 }
 0x30c   : > { %1365 = vmatmul.mubr.msk.bf16.vlgmr.msra.gmra.mrb[4].mxu1 %vm520_vm1, %v634_v27 }
 0x30d   : > { %1375 = vmatpush3.bf16.xpose.msra.mxu1 %v753_v31  ;;  %1376 = vmatprep.mubr.msk.bf16.mxu1 %vm1910_vm0, %v1909_v0 }
 0x30e   : > { %1386 = vmatprep.subr.bf16.mxu1 %v1909_v0 }
 0x314   : > { %1377 = vmatmul.mubr.msk.bf16.vlgmr.msra.gmra.mrb[8].mxu1 %vm520_vm1, %v746_v32 }
 0x315   : > { %1387 = vmatpush3.bf16.xpose.msra.mxu1 %v865_v34  ;;  %1388 = vmatprep.mubr.msk.bf16.mxu1 %vm1910_vm0, %v1909_v0 }
 0x316   : > { %1398 = vmatprep.subr.bf16.mxu1 %v1909_v0 }
 0x31c   : > { %1389 = vmatmul.mubr.msk.bf16.vlgmr.msra.gmra.mrb[12].mxu1 %vm520_vm1, %v858_v35 }
 0x31d   : > { %1402 = vmatprep.mubr.msk.bf16.mxu1 %vm1910_vm0, %v1909_v0  ;;  %1399 = vmatpush3.bf16.msra.mxu1 %v1543_v26 }
 0x31e   : > { %1400 = vmatprep.subr.bf16.mxu1 %v1909_v0 }
 0x321   : > { %1401 = vmatpush3.bf16.msra.mxu1 %v1544_v30 }
 0x3d7   : > { %v2365_v36 = vpop.f32.mrb[0].mxu1 }
 0x3d8   : > { %v1360_v37 = vpop.f32.mrb[1].mxu1 }
 0x3d9   : > { %v626_v38 = vpop.f32.mrb[2].mxu1 }
 0x3da   : > { %v1361_v39 = vpop.f32.mrb[3].mxu1 }
 0x3df   : > { %v677_v40 = vpop.f32.mrb[4].mxu1 }
 0x3e0   : > { %v678_v41 = vadd.f32 %v677_v40, %v2338_v13  ;;  %v1366_v42 = vpop.f32.mrb[5].mxu1 }
 0x3e1   : > { %v680_v43 = vpop.f32.mrb[6].mxu1 }
 0x3e2   : > { %v1367_v44 = vpop.f32.mrb[7].mxu1  ;;  %v683_v45 = vsel %vm520_vm1, %v678_v41, -inf }
 0x3e3   : > { %684 = vmax.xlane.f32.xlu1 %v683_v45 }
 0x3e7   : > { %v789_v46 = vpop.f32.mrb[8].mxu1 }
 0x3e8   : > { %v790_v47 = vadd.f32 %v789_v46, %v2338_v13  ;;  %v1378_v48 = vpop.f32.mrb[9].mxu1 }
 0x3e9   : > { %v792_v49 = vpop.f32.mrb[10].mxu1 }
 0x3ea   : > { %v1379_v50 = vpop.f32.mrb[11].mxu1  ;;  %v795_v51 = vsel %vm520_vm1, %v790_v47, -inf }
 0x3eb   : > { %796 = vmax.xlane.f32.xlu0 %v795_v51 }
 0x3ef   : > { %v901_v52 = vpop.f32.mrb[12].mxu1 }
 0x3f0   : > { %v1390_v53 = vpop.f32.mrb[13].mxu1  ;;  %v902_v56 = vadd.f32 %v901_v52, %v2338_v13 }
 0x3f1   : > { %v904_v54 = vpop.f32.mrb[14].mxu1 }
 0x3f2   : > { %v1391_v55 = vpop.f32.mrb[15].mxu1  ;;  %v907_v57 = vsel %vm520_vm1, %v902_v56, -inf }
 0x3f4   : > { %808 = vrot.lane.b32.xlu1 %v2322_v1, %s1919_s12 }
 0x401   : > { %696 = vrot.lane.b32.xlu0 %v2322_v1, %s1920_s26 }
 0x420   : > { %908 = vmax.xlane.f32.xlu0 %v907_v57  ;;  %v1054_v57 = vld [vmem:[%s443_s14] sm:$0xf]  ;;  %s2523_s14 = sld [smem:[#allocation35_spill]] }
 0x426   : > { %s2406_s13 = scalar_lea.hbm %s2523_s14, %s1328_s15 }
 0x436   : > { %920 = vrot.lane.b32.xlu0 %v2322_v1, %s1921_s25 }
 0x470   : > { %v685_v58 = vpop.xlane.xlu1 %684 }
 0x471   : > { %v686_v59 = vsub.f32 %v678_v41, %v685_v58  ;;  %v1321_v58 = vld [vmem:[#allocation10] ss:$0 sm:$0xff] }
 0x473   : > { %v687_v60 = vpack.c.bf16 %v686_v59, %v686_v59  ;;  %v1055_v59 = vunpack.c.l.bf16 %v1054_v57 }
 0x474   : > { %v809_v6 = vpop.permute.xlu1 %808 }
 0x475   : > { %v689_v61 = vmul.bf16 1069105081, %v687_v60  ;;  %v814_v7 = vsel %vm585_vm2, %v809_v6, 0 }
 0x477   : > { %1547 = vpow.bf16 %v689_v61 }
 0x478   : > { %v797_v62 = vpop.xlane.xlu0 %796 }
 0x479   : > { %v798_v63 = vsub.f32 %v790_v47, %v797_v62 }
 0x47b   : > { %v799_v2 = vpack.c.bf16 %v798_v63, %v798_v63 }
 0x47c   : > { %v697_v3 = vpop.permute.xlu0 %696 }
 0x47d   : > { %v801_v4 = vmul.bf16 1069105081, %v799_v2  ;;  %v702_v5 = vsel %vm585_vm2, %v697_v3, 0 }
 0x47e   : > { %1369 = vmatpush3.bf16.msra.mxu0 %v702_v5 }
 0x47f   : > { %1549 = vpow.bf16 %v801_v4  ;;  %1380 = vmatprep.subr.bf16.mxu0 %v1909_v0 }
 0x482   : > { %v1548_v1 = vpop.eup %1547 }
 0x483   : > { %1371 = vmatmul.mubr.msk.bf16.vlgmr.msra.gmra.mrb[4].mxu0 %vm520_vm1, %v1548_v1  ;;  %v691_v8 = vunpack.c.l.bf16 %v1548_v1 }
 0x484   : > { %1381 = vmatpush3.bf16.msra.mxu0 %v814_v7  ;;  %1382 = vmatprep.mubr.msk.bf16.mxu0 %vm1910_vm0, %v1909_v0 }
 0x485   : > { %v692_v9 = vsel %vm520_vm1, %v691_v8, 0.0  ;;  %1392 = vmatprep.subr.bf16.mxu0 %v1909_v0 }
 0x486   : > { %693 = vadd.xlane.f32.xlu0 %v692_v9 }
 0x48a   : > { %v1550_v10 = vpop.eup %1549 }
 0x48b   : > { %1383 = vmatmul.mubr.msk.bf16.vlgmr.msra.gmra.mrb[8].mxu0 %vm520_vm1, %v1550_v10  ;;  %v803_v11 = vunpack.c.l.bf16 %v1550_v10 }
 0x48c   : > { %1394 = vmatprep.mubr.msk.bf16.mxu0 %vm1910_vm0, %v1909_v0 }
 0x48d   : > { %v804_v12 = vsel %vm520_vm1, %v803_v11, 0.0 }
 0x48e   : > { %805 = vadd.xlane.f32.xlu1 %v804_v12  ;;  %v1325_v12 = vld [vmem:[#allocation13] ss:$0 sm:$0xff] }
 0x4ad   : > { %v909_v13 = vpop.xlane.xlu0 %908 }
 0x4ae   : > { %v910_v14 = vsub.f32 %v902_v56, %v909_v13 }
 0x4b0   : > { %v911_v15 = vpack.c.bf16 %v910_v14, %v910_v14  ;;  %v1326_v14 = vld [vmem:[#allocation14] ss:$0 sm:$0xff] }
 0x4b1   : > { %v921_v16 = vpop.permute.xlu0 %920 }
 0x4b2   : > { %v913_v17 = vmul.bf16 1069105081, %v911_v15  ;;  %v926_v18 = vsel %vm585_vm2, %v921_v16, 0 }
 0x4b3   : > { %1393 = vmatpush3.bf16.msra.mxu0 %v926_v18 }
 0x4b4   : > { %1551 = vpow.bf16 %v913_v17 }
 0x4bf   : > { %v1552_v19 = vpop.eup %1551 }
 0x4c0   : > { %1395 = vmatmul.mubr.msk.bf16.vlgmr.msra.gmra.mrb[12].mxu0 %vm520_vm1, %v1552_v19  ;;  %v915_v20 = vunpack.c.l.bf16 %v1552_v19 }
 0x4c2   : > { %v916_v21 = vsel %vm520_vm1, %v915_v20, 0.0 }
 0x4c3   : > { %917 = vadd.xlane.f32.xlu0 %v916_v21 }
 0x4c7   : > { %577 = vadd.xlane.f32.xlu0 %v576_v23 }
 0x513   : > { %v694_v24 = vpop.xlane.xlu0 %693 }
 0x514   : > { %1553 = vrcp.f32 %v694_v24 }
 0x51b   : > { %v806_v25 = vpop.xlane.xlu1 %805 }
 0x51c   : > { %1555 = vrcp.f32 %v806_v25 }
 0x51e   : > { %v1554_v27 = vpop.eup %1553 }
 0x526   : > { %v1556_v29 = vpop.eup %1555 }
 0x550   : > { %v918_v41 = vpop.xlane.xlu0 %917 }
 0x551   : > { %1557 = vrcp.f32 %v918_v41 }
 0x554   : > { %v578_v47 = vpop.xlane.xlu0 %577 }
 0x555   : > { %1559 = vrcp.f32 %v578_v47 }
 0x556   : > { %v738_v28 = vpop.f32.mrb[4].mxu0 }
 0x557   : > { %v744_v31 = vmul.f32 %v1554_v27, %v738_v28  ;;  %v1372_v32 = vpop.f32.mrb[5].mxu0 }
 0x558   : > { %v741_v33 = vpop.f32.mrb[6].mxu0 }
 0x559   : > { %v1373_v34 = vpop.f32.mrb[7].mxu0  ;;  %970 = vrot.lane.b32.xlu0 %v744_v31, %s1922_s30 }
 0x55b   : > { %v1558_v42 = vpop.eup %1557 }
 0x55e   : > { %v850_v35 = vpop.f32.mrb[8].mxu0 }
 0x55f   : > { %v856_v37 = vmul.f32 %v1556_v29, %v850_v35  ;;  %v1384_v38 = vpop.f32.mrb[9].mxu0  ;;  %v1560_v48 = vpop.eup %1559 }
 0x560   : > { %v853_v39 = vpop.f32.mrb[10].mxu0  ;;  %v629_v50 = vmul.f32 %v1560_v48, %v2365_v36 }
 0x561   : > { %974 = vrot.lane.b32.xlu1 %v856_v37, %s1923_s20  ;;  %v1385_v40 = vpop.f32.mrb[11].mxu0 }
 0x593   : > { %v962_v43 = vpop.f32.mrb[12].mxu0 }
 0x594   : > { %v968_v44 = vmul.f32 %v1558_v42, %v962_v43  ;;  %v1396_v45 = vpop.f32.mrb[13].mxu0 }
 0x595   : > { %v965_v0 = vpop.f32.mrb[14].mxu0 }
 0x596   : > { %v1397_v46 = vpop.f32.mrb[15].mxu0  ;;  %978 = vrot.lane.b32.xlu0 %v968_v44, %s1924_s27 }
 0x5cb   : > { %v971_v49 = vpop.permute.xlu0 %970 }
 0x5cc   : > { %v981_v52 = vsel %vm520_vm1, %v629_v50, %v971_v49 }
 0x5d3   : > { %v975_v51 = vpop.permute.xlu1 %974 }
 0x5d4   : > { %v983_v53 = vsel %vm982_vm3, %v981_v52, %v975_v51 }
 0x608   : > { %v979_v54 = vpop.permute.xlu0 %978 }
 0x609   : > { %v985_v55 = vsel %vm984_vm4, %v983_v53, %v979_v54 }
 0x60a   : > { %v986_v56 = vpack.c.bf16 %v985_v55, %v985_v55 }
 0x60c   : > { %1403 = vmatmul.mubr.msk.bf16.vlgmr.msra.gmra.mrb[16].mxu1 %vm1010_vm5, %v986_v56 }
 0x6df   : > { %v1048_v60 = vpop.f32.mrb[16].mxu1 }
 0x6e0   : > { %v1049_v61 = vadd.f32 %v1321_v58, %v1048_v60  ;;  %v1404_v62 = vpop.f32.mrb[17].mxu1 }
 0x6e1   : > { %v1051_v36 = vpop.f32.mrb[18].mxu1 }
 0x6e2   : > { %v1405_v63 = vpop.f32.mrb[19].mxu1  ;;  %v1056_v2 = vadd.f32 %v1055_v59, %v1049_v61 }
 0x6e4   : > { %v1057_v3 = vsel %vm1010_vm5, %v1056_v2, 0.0 }
 0x6e5   : > { %1058 = vadd.xlane.f32.xlu0 %v1057_v3 }
 0x772   : > { %v1059_v4 = vpop.xlane.xlu0 %1058 }
 0x773   : > { %v1061_v5 = vmul.f32 0.03125, %v1059_v4 }
 0x775   : > { %v1062_v6 = vsub.f32 %v1056_v2, %v1061_v5 }
 0x777   : > { %v1063_v7 = vmul.f32 %v1062_v6, %v1062_v6 }
 0x779   : > { %v1064_v1 = vsel %vm1010_vm5, %v1063_v7, 0.0 }
 0x77a   : > { %1065 = vadd.xlane.f32.xlu1 %v1064_v1 }
 0x807   : > { %v1066_v8 = vpop.xlane.xlu1 %1065 }
 0x808   : > { %v1067_v9 = vmul.f32 0.03125, %v1066_v8 }
 0x80a   : > { %v1068_v10 = vadd.f32 1e-12, %v1067_v9 }
 0x80c   : > { %1561 = vrsqrt.f32 %v1068_v10 }
 0x816   : > { %v1562_v11 = vpop.eup %1561 }
 0x817   : > { %v1070_v13 = vmul.f32 %v1562_v11, %v1062_v6 }
 0x819   : > { %v1078_v15 = vmul.f32 %v1325_v12, %v1070_v13 }
 0x81b   : > { %v1086_v16 = vadd.f32 %v1326_v14, %v1078_v15 }
 0x81d   : > { %v1087_v17 = vpack.c.bf16 %v1086_v16, %v1086_v16 }
 0x81f   : > { %1089 = vst.msk [vmem:[%s497_s16] sm:$0xf] %vm1088_vm6, %v1087_v17 }
 0x820   : > { %1808 = shalt.err (!%p1805_p6)
}
 0x821   : > { %s1809_s22 = scalar_lea.hbm %s2406_s13, 64  ;;  %s1813_s19 = scalar_lea.hbm %s2523_s14, 128 }
 0x822   : > { %p1810_p1 = scmp.ne.s32.totalorder %s2406_s13, %s1809_s22  ;;  %p1814_p13 = scmp.lt.u32.totalorder %s2406_s13, %s2523_s14 }
 0x823   : > { %p1815_p2 = scmp.lt.u32.totalorder %s1813_s19, %s1809_s22  ;;  %p1817_p3 = scmp.lt.u32.totalorder %s1809_s22, %s2406_s13 }
 0x824   : > { %p1811_p11 = pnand %p1810_p1, %p2524_p0 }
 0x825   : > { %p1816_p12 = por %p1815_p2, %p1814_p13 }
 0x826   : > { %p1812_p8 = pneg %p1811_p11 }
 0x827   : > { %p1818_p4 = por %p1817_p3, %p1816_p12 }
 0x829   : > { %p1819_p9 = pnand %p1818_p4, %p1812_p8 }
 0x82b   : > { %1822 = shalt.err (!%p1819_p9)
}
 0x82c   : > { %1430 = dma.vmem_to_hbm [thread:$0]  (%p2524_p0), %s2408_s8, 64, %s2406_s13, %s1091_s11  }
 0x82d PF: > { %s2525_s25 = sld [smem:[#allocation24_spill]]  ;;  %s2526_s30 = sld [smem:[#allocation27_spill]] }
 0x82e   : > { %p2528_p7 = scmp.ge.s32.totalorder %s1897_s10, 2 }
 0x833   : > { %s1117_s20 = sand.u32 1, %s2525_s25   ;;  %p2527_p5 = scmp.ne.s32.totalorder %s2526_s30, 0 }
 0x834   : > { %s1118_s27 = scalar_lea.sflag [#allocation4], %s1117_s20 }
 0x835   : > { %p1459_p10 = pnand %p2528_p7, %p2527_p5 }
 0x837   : > { %1872 = dma.done.wait (!%p1459_p10), %s1118_s27, 64  }
 0x838   : > { %1874 = vsyncadd (!%p1459_p10), %s1118_s27, 4294967232  ;;  %s32_s10 = sadd.s32 1, %s1897_s10   ;;  %s2529_s17 = sld [smem:[#allocation25_spill]] }
 0x839   : > { %p29_p6 = scmp.ge.s32.totalorder %s32_s10, 4   ;;  %s2530_s29 = sld [smem:[#allocation30_spill]] }
 0x83a   : > { %s2531_s0 = sld [smem:[#allocation28_spill]]  ;;  %s2532_s27 = smov %s1881_s28 }
 0x83b   : > { %s2534_s30 = smov %s1893_s9  ;;  %31 = sbr.rel (!%p29_p6) target bundleno = 18 (0x12), region = 150 }
 0x83e   : > { %s2533_s28 = smov %s2529_s17 }
 0x840   : > { %s2535_s9 = smov %s2531_s0 }
 0x842   :  { %1123 = vsyncpa [#allocation3], 1 }
 0x843   :  { %1125 = vsyncpa [#allocation3 + $0x1], 1 }
 0x844   :  { %1126 = vsyncpa [#allocation6], 1 }
 0x845   :  { %1128 = vsyncpa [#allocation6 + $0x1], 1 }
 0x846   :  { %1129 = vsyncpa [#allocation9], 1 }
 0x847   :  { %1130 = vsyncpa [#allocation12], 1 }
 0x848   :  { %1132 = vsyncpa [#allocation12 + $0x1], 1 }
 0x849   :  { %1133 = vsyncpa [#allocation15], 1 }
 0x84a   :  { %1134 = vsyncpa [#allocation4], 1 }
 0x84b   :  { %1136 = vsyncpa [#allocation4 + $0x1], 1 }

// kernel: bert_forward.13
= control target key start
LH: loop header
LB: loop body
LE: loop exit
PB: predicated region body
PF: predicated region fallthrough
CT: control target
= control target key end

     0   :  { %11 = vsyncpa [#allocation4], 0  ;;  %s718_s0 = inlined_call_operand.hbm [shape: bf16[16,128], index: 0, kind: input, shape index: {}]   ;;  %s719_s1 = inlined_call_operand.hbm [shape: bf16[128,32], index: 1, kind: input, shape index: {}]   ;;  %s720_s2 = inlined_call_operand.hbm [shape: f32[1,32], index: 2, kind: input, shape index: {}]   ;;  %s721_s3 = inlined_call_operand.hbm [shape: bf16[16,32], index: 3, kind: input, shape index: {}]   ;;  %s722_s4 = inlined_call_operand.hbm [shape: f32[1,32], index: 4, kind: input, shape index: {}]   ;;  %s723_s5 = inlined_call_operand.hbm [shape: f32[1,32], index: 5, kind: input, shape index: {}]   ;;  %s724_s6 = inlined_call_operand.hbm [shape: bf16[16,32], index: 6, kind: output, shape index: {}]  }
   0x1   :  { %12 = vsyncpa [#allocation7], 0 }
   0x2   :  { %13 = vsyncpa [#allocation10], 0 }
   0x3   :  { %14 = vsyncpa [#allocation13], 0 }
   0x4   :  { %15 = vsyncpa [#allocation5], 0  ;;  %s561_s21 = smov [#allocation6]   ;;  %s562_s23 = smov [#allocation9]  }
   0x5   :  { %s33_s22 = sshll.u32 %s561_s21, 4  ;;  %s55_s24 = sshll.u32 %s562_s23, 4  ;;  %s34_s22 = int_to_ptr.vmem [resolvable:$true] %s33_s22  ;;  %s607_s24 = int_to_ptr.vmem [resolvable:$true] %s55_s24 }
   0x6   :  { %s397_s27 = scalar_lea.hbm %s719_s1, 1024 }
   0x7   :  { %p398_p0 = scmp.ne.s32.totalorder %s719_s1, %s397_s27  ;;  %p401_p1 = scmp.lt.u32.totalorder %s397_s27, %s719_s1 }
   0x9   :  { %p403_p2 = pnand %p401_p1, %p398_p0 }
   0xb   :  { %406 = shalt.err (!%p403_p2)
}
   0xc   :  { %s407_s8 = scalar_lea.vmem %s34_s22, 1024  ;;  %p412_p4 = scmp.lt.s32.totalorder %s34_s22, %s34_s22 }
   0xd   :  { %p408_p3 = scmp.ne.s32.totalorder %s34_s22, %s407_s8  ;;  %p413_p5 = scmp.lt.s32.totalorder %s407_s8, %s407_s8 }
   0xf   :  { %p414_p6 = por %p413_p5, %p412_p4 }
  0x11   :  { %p415_p7 = pnand %p414_p6, %p408_p3 }
  0x13   :  { %418 = shalt.err (!%p415_p7)
}
  0x14   :  { %s563_s9 = smov 64   ;;  %s564_s10 = smov 4  }
  0x15   :  { %39 = dma.hbm_to_vmem [thread:$0]  %s719_s1, 1024, %s34_s22, [#allocation7], %s563_s9, %s563_s9, %s564_s10  }
  0x16   :  { %s419_s15 = scalar_lea.hbm %s721_s3, 128 }
  0x17   :  { %p420_p8 = scmp.ne.s32.totalorder %s721_s3, %s419_s15  ;;  %p423_p9 = scmp.lt.u32.totalorder %s419_s15, %s721_s3 }
  0x19   :  { %p425_p10 = pnand %p423_p9, %p420_p8 }
  0x1b   :  { %428 = shalt.err (!%p425_p10)
}
  0x1c   :  { %s429_s20 = scalar_lea.vmem %s607_s24, 128  ;;  %p434_p12 = scmp.lt.s32.totalorder %s607_s24, %s607_s24 }
  0x1d   :  { %p430_p11 = scmp.ne.s32.totalorder %s607_s24, %s429_s20  ;;  %p435_p13 = scmp.lt.s32.totalorder %s429_s20, %s429_s20 }
  0x1f   :  { %p436_p0 = por %p435_p13, %p434_p12 }
  0x21   :  { %p437_p1 = pnand %p436_p0, %p430_p11 }
  0x23   :  { %440 = shalt.err (!%p437_p1)
}
  0x24   :  { %61 = dma.hbm_to_vmem [thread:$0]  %s721_s3, 128, %s607_s24, [#allocation10], %s563_s9, %s563_s9, %s564_s10  }
  0x25   :  { %s565_s22 = smov [#allocation3]   ;;  %s566_s25 = smov [#allocation8]  }
  0x26   :  { %s21_s23 = sshll.u32 %s565_s22, 4  ;;  %s46_s26 = sshll.u32 %s566_s25, 4  ;;  %s22_s23 = int_to_ptr.vmem [resolvable:$true] %s21_s23  ;;  %s47_s26 = int_to_ptr.vmem [resolvable:$true] %s46_s26 }
  0x27   :  { %s441_s29 = scalar_lea.hbm %s718_s0, 128 }
  0x28   :  { %p442_p2 = scmp.ne.s32.totalorder %s718_s0, %s441_s29  ;;  %p445_p3 = scmp.lt.u32.totalorder %s441_s29, %s718_s0 }
  0x2a   :  { %p447_p4 = pnand %p445_p3, %p442_p2 }
  0x2c   :  { %450 = shalt.err (!%p447_p4)
}
  0x2d   :  { %s451_s3 = scalar_lea.vmem %s22_s23, 128  ;;  %p456_p6 = scmp.lt.s32.totalorder %s22_s23, %s22_s23 }
  0x2e   :  { %p452_p5 = scmp.ne.s32.totalorder %s22_s23, %s451_s3  ;;  %p457_p7 = scmp.lt.s32.totalorder %s451_s3, %s451_s3 }
  0x30   :  { %p458_p8 = por %p457_p7, %p456_p6 }
  0x32   :  { %p459_p9 = pnand %p458_p8, %p452_p5 }
  0x34   :  { %462 = shalt.err (!%p459_p9)
}
  0x35   :  { %27 = dma.hbm_to_vmem [thread:$0]  %s718_s0, 128, %s22_s23, [#allocation4], %s563_s9, %s563_s9, %s564_s10  }
  0x36   :  { %s463_s15 = scalar_lea.hbm %s720_s2, 16 }
  0x37   :  { %p464_p10 = scmp.ne.s32.totalorder %s720_s2, %s463_s15  ;;  %p467_p11 = scmp.lt.u32.totalorder %s463_s15, %s720_s2 }
  0x39   :  { %p469_p12 = pnand %p467_p11, %p464_p10 }
  0x3b   :  { %472 = shalt.err (!%p469_p12)
}
  0x3c   :  { %s473_s20 = scalar_lea.vmem %s47_s26, 16  ;;  %s477_s1 = scalar_lea.vmem %s47_s26, 32 }
  0x3d   :  { %p474_p13 = scmp.ne.s32.totalorder %s47_s26, %s473_s20  ;;  %p478_p0 = scmp.lt.s32.totalorder %s47_s26, %s47_s26 }
  0x3e   :  { %p479_p1 = scmp.lt.s32.totalorder %s477_s1, %s473_s20 }
  0x40   :  { %p480_p2 = por %p479_p1, %p478_p0 }
  0x42   :  { %p481_p3 = pnand %p480_p2, %p474_p13 }
  0x44   :  { %484 = shalt.err (!%p481_p3)
}
  0x45   :  { %49 = dma.hbm_to_vmem [thread:$0]  %s720_s2, 16, %s47_s26, [#allocation7]  }
  0x46   :  { %s567_s22 = smov [#allocation11]   ;;  %s568_s25 = smov [#allocation12]  }
  0x47   :  { %s68_s23 = sshll.u32 %s567_s22, 4  ;;  %s78_s27 = sshll.u32 %s568_s25, 4  ;;  %s69_s23 = int_to_ptr.vmem [resolvable:$true] %s68_s23  ;;  %s79_s27 = int_to_ptr.vmem [resolvable:$true] %s78_s27 }
  0x48   :  { %s485_s30 = scalar_lea.hbm %s722_s4, 16 }
  0x49   :  { %p486_p4 = scmp.ne.s32.totalorder %s722_s4, %s485_s30  ;;  %p489_p5 = scmp.lt.u32.totalorder %s485_s30, %s722_s4 }
  0x4b   :  { %p491_p6 = pnand %p489_p5, %p486_p4 }
  0x4d   :  { %494 = shalt.err (!%p491_p6)
}
  0x4e   :  { %s495_s2 = scalar_lea.vmem %s69_s23, 16  ;;  %s499_s26 = scalar_lea.vmem %s69_s23, 32 }
  0x4f   :  { %p496_p7 = scmp.ne.s32.totalorder %s69_s23, %s495_s2  ;;  %p500_p8 = scmp.lt.s32.totalorder %s69_s23, %s69_s23 }
  0x50   :  { %p501_p9 = scmp.lt.s32.totalorder %s499_s26, %s495_s2 }
  0x52   :  { %p502_p10 = por %p501_p9, %p500_p8 }
  0x54   :  { %p503_p11 = pnand %p502_p10, %p496_p7 }
  0x56   :  { %506 = shalt.err (!%p503_p11)
}
  0x57   :  { %71 = dma.hbm_to_vmem [thread:$0]  %s722_s4, 16, %s69_s23, [#allocation10]  }
  0x58   :  { %s507_s15 = scalar_lea.hbm %s723_s5, 16 }
  0x59   :  { %p508_p12 = scmp.ne.s32.totalorder %s723_s5, %s507_s15  ;;  %p511_p13 = scmp.lt.u32.totalorder %s507_s15, %s723_s5 }
  0x5b   :  { %p513_p0 = pnand %p511_p13, %p508_p12 }
  0x5d   :  { %516 = shalt.err (!%p513_p0)
}
  0x5e   :  { %s517_s20 = scalar_lea.vmem %s79_s27, 16  ;;  %s521_s1 = scalar_lea.vmem %s79_s27, 32 }
  0x5f   :  { %p518_p1 = scmp.ne.s32.totalorder %s79_s27, %s517_s20  ;;  %p522_p2 = scmp.lt.s32.totalorder %s79_s27, %s79_s27 }
  0x60   :  { %p523_p3 = scmp.lt.s32.totalorder %s521_s1, %s517_s20 }
  0x62   :  { %p524_p4 = por %p523_p3, %p522_p2 }
  0x64   :  { %p525_p5 = pnand %p524_p4, %p518_p1 }
  0x66   :  { %528 = shalt.err (!%p525_p5)
}
  0x67   :  { %81 = dma.hbm_to_vmem [thread:$0]  %s723_s5, 16, %s79_s27, [#allocation13]  }
  0x68   :  { %551 = dma.done.wait [#allocation4], 128  }
  0x69   :  { %552 = vsyncadd [#allocation4], 4294967168 }
  0x6a   :  { %553 = dma.done.wait [#allocation7], 1040  }
  0x6b   :  { %554 = vsyncadd [#allocation7], 4294966256 }
  0x6c   :  { %555 = dma.done.wait [#allocation10], 144  }
  0x6d   :  { %556 = vsyncadd [#allocation10], 4294967152 }
  0x6e   :  { %557 = dma.done.wait [#allocation13], 16  }
  0x6f   :  { %558 = vsyncadd [#allocation13], 4294967280  ;;  %vm105_vm0 = vcmask 261120   ;;  %v569_v0 = vmov 0.0   ;;  %vm570_vm1 = vmmov 0   ;;  %v384_v1 = vld [vmem:[#allocation6] sm:$0xff]  }
  0x70   :  { %353 = vmatprep.subr.bf16.mxu0 %v569_v0  ;;  %369 = vmatprep.mubr.msk.bf16.mxu0 %vm570_vm1, %v569_v0  ;;  %106 = vst.msk [vmem:[#allocation2] sm:$0xff] %vm105_vm0, %v569_v0  ;;  %107 = vst.msk [vmem:[#allocation2 + $0x8] sm:$0xff] %vm105_vm0, %v569_v0  ;;  %v385_v2 = vld [vmem:[#allocation6 + $0x8] sm:$0xff]   ;;  %v386_v3 = vld [vmem:[#allocation6 + $0x10] sm:$0xff]   ;;  %vm301_vm2 = vcmask 257024   ;;  %s571_s5 = smov [#allocation14]  }
  0x71   :  { %354 = vmatpush3.bf16.msra.mxu0 %v384_v1  ;;  %v387_v4 = vld [vmem:[#allocation6 + $0x18] sm:$0xff]   ;;  %v388_v5 = vld [vmem:[#allocation6 + $0x20] sm:$0xff]   ;;  %v389_v6 = vld [vmem:[#allocation6 + $0x28] sm:$0xff]   ;;  %s309_s21 = sshll.u32 %s571_s5, 4  ;;  %s310_s21 = int_to_ptr.vmem [resolvable:$true] %s309_s21 }
  0x72   :  { %355 = vmatprep.subr.bf16.mxu0 %v569_v0  ;;  %v390_v7 = vld [vmem:[#allocation6 + $0x30] sm:$0xff]   ;;  %v391_v8 = vld [vmem:[#allocation6 + $0x38] sm:$0xff]   ;;  %v341_v18 = vld [vmem:[#allocation9] sm:$0xff]   ;;  %s529_s22 = scalar_lea.vmem %s310_s21, 128  ;;  %p534_p7 = scmp.lt.s32.totalorder %s310_s21, %s310_s21 }
  0x73   :  { %v392_v9 = vld [vmem:[#allocation3] sm:$0xff]   ;;  %v333_v19 = vld [vmem:[#allocation8] ss:$0 sm:$0xff]  ;;  %v342_v20 = vunpack.c.l.bf16 %v341_v18  ;;  %v343_v23 = vunpack.c.h.bf16 %v341_v18  ;;  %v334_v47 = vld [vmem:[#allocation11] ss:$0 sm:$0xff]  ;;  %p530_p6 = scmp.ne.s32.totalorder %s310_s21, %s529_s22  ;;  %p535_p8 = scmp.lt.s32.totalorder %s529_s22, %s529_s22 }
  0x74   :  { %v335_v49 = vld [vmem:[#allocation12] ss:$0 sm:$0xff] }
  0x75   :  { %356 = vmatpush3.bf16.msra.mxu0 %v385_v2  ;;  %p536_p9 = por %p535_p8, %p534_p7 }
  0x76   :  { %357 = vmatprep.subr.bf16.mxu0 %v569_v0 }
  0x77   :  { %v108_v10 = vld [vmem:[#allocation2] sm:$0xff]  ;;  %v109_v12 = vld [vmem:[#allocation2 + $0x8] sm:$0xff]  ;;  %p537_p10 = pnand %p536_p9, %p530_p6 }
  0x79   :  { %358 = vmatpush3.bf16.msra.mxu0 %v386_v3 }
  0x7a   :  { %359 = vmatprep.subr.bf16.mxu0 %v569_v0 }
  0x7d   :  { %360 = vmatpush3.bf16.msra.mxu0 %v387_v4 }
  0x7e   :  { %361 = vmatprep.subr.bf16.mxu0 %v569_v0 }
  0x81   :  { %362 = vmatpush3.bf16.msra.mxu0 %v388_v5 }
  0x82   :  { %363 = vmatprep.subr.bf16.mxu0 %v569_v0 }
  0x85   :  { %364 = vmatpush3.bf16.msra.mxu0 %v389_v6 }
  0x86   :  { %365 = vmatprep.subr.bf16.mxu0 %v569_v0 }
  0x89   :  { %366 = vmatpush3.bf16.msra.mxu0 %v390_v7 }
  0x8a   :  { %367 = vmatprep.subr.bf16.mxu0 %v569_v0 }
  0x8d   :  { %368 = vmatpush3.bf16.msra.mxu0 %v391_v8 }
  0x90   :  { %370 = vmatmul.mubr.bf16.vlgmr.msra.gmra.mrb[0].mxu0 %v392_v9 }
 0x163   :  { %v216_v11 = vpop.f32.mrb[0].mxu0 }
 0x164   :  { %v223_v13 = vadd.f32 %v216_v11, %v108_v10  ;;  %v371_v14 = vpop.f32.mrb[1].mxu0 }
 0x165   :  { %v219_v15 = vpop.f32.mrb[2].mxu0 }
 0x166   :  { %226 = vst.msk [vmem:[#allocation2] sm:$0xff] %vm105_vm0, %v223_v13  ;;  %v224_v16 = vadd.f32 %v219_v15, %v109_v12  ;;  %v372_v17 = vpop.f32.mrb[3].mxu0 }
 0x168   :  { %227 = vst.msk [vmem:[#allocation2 + $0x8] sm:$0xff] %vm105_vm0, %v224_v16 }
 0x16d   :  { %v231_v21 = vld [vmem:[#allocation2] sm:$0xff] }
 0x16e   :  { %v240_v22 = vadd.f32 %v333_v19, %v231_v21 }
 0x16f   :  { %v232_v24 = vld [vmem:[#allocation2 + $0x8] sm:$0xff] }
 0x170   :  { %v246_v25 = vadd.f32 %v342_v20, %v240_v22  ;;  %v241_v26 = vadd.f32 %v333_v19, %v232_v24 }
 0x172   :  { %v248_v27 = vsel %vm105_vm0, %v246_v25, 0.0  ;;  %v247_v28 = vadd.f32 %v343_v23, %v241_v26 }
 0x173   :  { %249 = vadd.xlane.f32.xlu0 %v248_v27 }
 0x174   :  { %v251_v29 = vsel %vm105_vm0, %v247_v28, 0.0 }
 0x177   :  { %252 = vadd.xlane.f32.xlu0 %v251_v29 }
 0x200   :  { %v250_v30 = vpop.xlane.xlu0 %249 }
 0x201   :  { %v255_v31 = vmul.f32 0.03125, %v250_v30 }
 0x203   :  { %v257_v32 = vsub.f32 %v246_v25, %v255_v31 }
 0x204   :  { %v253_v33 = vpop.xlane.xlu0 %252 }
 0x205   :  { %v256_v34 = vmul.f32 0.03125, %v253_v33  ;;  %v259_v35 = vmul.f32 %v257_v32, %v257_v32 }
 0x207   :  { %v258_v36 = vsub.f32 %v247_v28, %v256_v34  ;;  %v261_v37 = vsel %vm105_vm0, %v259_v35, 0.0 }
 0x208   :  { %262 = vadd.xlane.f32.xlu1 %v261_v37 }
 0x209   :  { %v260_v38 = vmul.f32 %v258_v36, %v258_v36 }
 0x20b   :  { %v264_v39 = vsel %vm105_vm0, %v260_v38, 0.0 }
 0x20c   :  { %265 = vadd.xlane.f32.xlu1 %v264_v39 }
 0x295   :  { %v263_v40 = vpop.xlane.xlu1 %262 }
 0x296   :  { %v267_v41 = vmul.f32 0.03125, %v263_v40 }
 0x298   :  { %v269_v42 = vadd.f32 1e-12, %v267_v41 }
 0x299   :  { %v266_v43 = vpop.xlane.xlu1 %265 }
 0x29a   :  { %393 = vrsqrt.f32 %v269_v42  ;;  %v268_v44 = vmul.f32 0.03125, %v266_v43 }
 0x29c   :  { %v270_v45 = vadd.f32 1e-12, %v268_v44 }
 0x29e   :  { %395 = vrsqrt.f32 %v270_v45 }
 0x2a4   :  { %v394_v46 = vpop.eup %393 }
 0x2a5   :  { %v273_v48 = vmul.f32 %v394_v46, %v257_v32 }
 0x2a7   :  { %v282_v50 = vmul.f32 %v334_v47, %v273_v48 }
 0x2a8   :  { %v396_v51 = vpop.eup %395 }
 0x2a9   :  { %v274_v52 = vmul.f32 %v396_v51, %v258_v36  ;;  %v291_v53 = vadd.f32 %v335_v49, %v282_v50 }
 0x2ab   :  { %v283_v54 = vmul.f32 %v334_v47, %v274_v52  ;;  %v338_v55 = vpack.c.bf16 %v291_v53, %v291_v53 }
 0x2ad   :  { %v292_v56 = vadd.f32 %v335_v49, %v283_v54  ;;  %302 = vst.msk [vmem:[#allocation14] sm:$0xf] %vm301_vm2, %v338_v55 }
 0x2af   :  { %v339_v57 = vpack.c.bf16 %v292_v56, %v292_v56 }
 0x2b1   :  { %303 = vst.msk [vmem:[#allocation14 + $0x4] sm:$0xf] %vm301_vm2, %v339_v57 }
 0x2b2   :  { %540 = shalt.err (!%p537_p10)
}
 0x2b3   :  { %s541_s27 = scalar_lea.hbm %s724_s6, 128 }
 0x2b4   :  { %p542_p11 = scmp.ne.s32.totalorder %s724_s6, %s541_s27  ;;  %p545_p12 = scmp.lt.u32.totalorder %s541_s27, %s724_s6 }
 0x2b6   :  { %p547_p13 = pnand %p545_p12, %p542_p11 }
 0x2b8   :  { %550 = shalt.err (!%p547_p13)
}
 0x2b9   :  { %315 = dma.vmem_to_hbm [thread:$0]  %s310_s21, 128, %s724_s6, [#allocation5], %s563_s9, %s563_s9, %s564_s10  }
 0x2ba   :  { %559 = dma.done.wait [#allocation5], 128  }
 0x2bb   :  { %560 = vsyncadd [#allocation5], 4294967168 }
 0x2bc   :  { %319 = vsyncpa [#allocation4], 1 }
 0x2bd   :  { %320 = vsyncpa [#allocation7], 1 }
 0x2be   :  { %321 = vsyncpa [#allocation10], 1 }
 0x2bf   :  { %322 = vsyncpa [#allocation13], 1 }
 0x2c0   :  { %323 = vsyncpa [#allocation5], 1 }

</bundles_post_ra>
